<compile_context>
chip_gen: v5e
topology: v5e:2x2
jax: 0.10.0
libtpu: 0.0.40
codegen_flags: <defaults>
</compile_context>

<pallas_src>
import functools

import numpy as np
import jax
import jax.numpy as jnp
from jax import lax
from jax.experimental import pallas as pl
from jax.experimental.pallas import tpu as pltpu

_EPS = 1e-5


# ---------------------------------------------------------------------------
# Fused kernel: one grid step == one batch element, everything in VMEM.
# ---------------------------------------------------------------------------
def _upsample_block_kernel(*refs, has_upconv):
    if has_upconv:
        (x_ref, skip_ref, bup_bias_ref, bup_band_ref,
         b1_ref, sh1_ref, b2_ref, sh2_ref, o_ref, a1, a2) = refs
    else:
        (x_ref, skip_ref,
         b1_ref, sh1_ref, b2_ref, sh2_ref, o_ref, a1, a2) = refs

    f32 = jnp.float32
    bf16 = jnp.bfloat16
    Ho = a1.shape[0] - 2          # output spatial rows (== skip rows)

    # ---------- upconv: ConvTranspose2d(k3,s2,p1,op1), phase-decomposed ----------
    if has_upconv:
        x2d = x_ref[0]                                                     # (H, W*Ci) bf16
        H = x2d.shape[0]
        # per-input-row banded matmuls (within-row kx taps folded into the bands)
        t_even = jnp.dot(x2d, bup_band_ref[0], preferred_element_type=f32)  # -> out row 2m
        t_low = jnp.dot(x2d, bup_band_ref[1], preferred_element_type=f32)   # -> out row 2m+1
        t_high = jnp.dot(x2d, bup_band_ref[2], preferred_element_type=f32)  # -> out row 2m-1
        # interleave the row phases with tiny 0/1 scatter matmuls (no strided stores)
        r = lax.broadcasted_iota(jnp.int32, (Ho, H), 0)
        m = lax.broadcasted_iota(jnp.int32, (Ho, H), 1)
        u = (jnp.dot((r == 2 * m).astype(f32), t_even, preferred_element_type=f32)
             + jnp.dot((r == 2 * m + 1).astype(f32), t_low, preferred_element_type=f32)
             + jnp.dot((r == 2 * m - 1).astype(f32), t_high, preferred_element_type=f32))
        u = u + bup_bias_ref[...]                                          # (Ho, Wo*Ci) f32
    else:
        u = x_ref[0].astype(f32)                                           # (Ho, Wo*Ci)

    # ---------- fused concat: [upsampled x | skip] into one row-haloed scratch ----------
    zero1 = jnp.zeros((1, a1.shape[1]), f32)
    a1[0:1, :] = zero1                       # zero halo rows == conv "same" padding in H
    a1[Ho + 1:Ho + 2, :] = zero1
    a1[1:Ho + 1, :] = jnp.concatenate([u, skip_ref[0].astype(f32)], axis=1)

    # ---------- conv1 (3x3, pad 1) + folded BN1 + ReLU: 3 banded bf16 matmuls ----------
    acc1 = jnp.dot(a1[0:Ho, :].astype(bf16), b1_ref[0], preferred_element_type=f32)
    acc1 = acc1 + jnp.dot(a1[1:Ho + 1, :].astype(bf16), b1_ref[1], preferred_element_type=f32)
    acc1 = acc1 + jnp.dot(a1[2:Ho + 2, :].astype(bf16), b1_ref[2], preferred_element_type=f32)
    h1 = jnp.maximum(acc1 + sh1_ref[...], 0.0)                             # (Ho, Wo*Co) f32

    zero2 = jnp.zeros((1, a2.shape[1]), f32)
    a2[0:1, :] = zero2
    a2[Ho + 1:Ho + 2, :] = zero2
    a2[1:Ho + 1, :] = h1

    # ---------- conv2 (3x3, pad 1) + folded BN2 + ReLU ----------
    acc2 = jnp.dot(a2[0:Ho, :].astype(bf16), b2_ref[0], preferred_element_type=f32)
    acc2 = acc2 + jnp.dot(a2[1:Ho + 1, :].astype(bf16), b2_ref[1], preferred_element_type=f32)
    acc2 = acc2 + jnp.dot(a2[2:Ho + 2, :].astype(bf16), b2_ref[2], preferred_element_type=f32)
    o_ref[0] = jnp.maximum(acc2 + sh2_ref[...], 0.0).astype(o_ref.dtype)   # lane-dense store


# ---------------------------------------------------------------------------
# Host-side weight preprocessing: banded matmul weights for row-flattened convs.
# ---------------------------------------------------------------------------
def _band_conv3x3(w_hwio, Wsp):
    """(3,3,Cin,Cout) conv weights -> (3, Wsp*Cin, Wsp*Cout) banded matrices (one per kh).
    band[kh][wi*Cin+ci, wo*Cout+co] = w[kh, wi-wo+1, ci, co]; spatial zero-padding along W
    is folded into the band (entries outside [0,Wsp) simply don't exist)."""
    _, _, Cin, Cout = w_hwio.shape
    wi = jnp.arange(Wsp)
    wo = jnp.arange(Wsp)
    bands = []
    for kh in range(3):
        B = jnp.zeros((Wsp, Cin, Wsp, Cout), jnp.float32)
        for kw in range(3):
            ind = (wi[:, None] == wo[None, :] + kw - 1).astype(jnp.float32)
            B = B + ind[:, None, :, None] * w_hwio[kh, kw][None, :, None, :]
        bands.append(B.reshape(Wsp * Cin, Wsp * Cout))
    return jnp.stack(bands)


def _band_upconv_rows(w_t, Wsp):
    """ConvTranspose2d(k3,s2,p1,op1) weight (Cin,Cout,3,3) -> (3, Wsp*Cin, 2*Wsp*Cout).
    Row-phase decomposition (no zero-inserted intermediate):
      band[0]: ky=1, input row m -> even output row 2m
      band[1]: ky=2, input row m -> odd  output row 2m+1
      band[2]: ky=0, input row m -> odd  output row 2m-1
    Within a row, input pixel n hits output pixels 2n-1 (kx=0), 2n (kx=1), 2n+1 (kx=2)."""
    Wo = 2 * Wsp
    n = jnp.arange(Wsp)
    ox = jnp.arange(Wo)
    ind = [(ox[None, :] == 2 * n[:, None] + kx - 1).astype(jnp.float32) for kx in range(3)]

    def row_band(ky):
        B = sum(ind[kx][:, None, :, None] * w_t[:, :, ky, kx][None, :, None, :]
                for kx in range(3))
        return B.reshape(Wsp * w_t.shape[0], Wo * w_t.shape[1])

    return jnp.stack([row_band(1), row_band(2), row_band(0)])


def _bn_scale_shift(gamma, beta, mean, var):
    scale = gamma / jnp.sqrt(var + _EPS)
    return scale, beta - mean * scale


def _batch_spec(shape):
    return pl.BlockSpec((1,) + tuple(shape[1:]), lambda n: (n, 0, 0))


def _rep_spec(shape):
    nd = len(shape)
    return pl.BlockSpec(tuple(shape), lambda n: (0,) * nd)


# ---------------------------------------------------------------------------
# UpsampleBlock forward (Pallas path). Inputs/outputs NCHW like PyTorch.
# ---------------------------------------------------------------------------
def upsample_block_forward(params, x_nchw, skip_nchw, is_upblock1=False):
    N, Cs, Ho, Wo = skip_nchw.shape
    Ci = x_nchw.shape[1]
    Co = params["w1"].shape[0]
    has_upconv = not is_upblock1

    # NCHW -> NHWC -> row-flattened (rows, W*C); cast activations to bf16 for the MXU.
    # TODO(synk): if the surrounding model carries NHWC these transposes disappear.
    skip_rows = (jnp.transpose(skip_nchw, (0, 2, 3, 1))
                 .reshape(N, Ho, Wo * Cs).astype(jnp.bfloat16))
    xs = jnp.transpose(x_nchw, (0, 2, 3, 1))
    x_rows = xs.reshape(N, xs.shape[1], xs.shape[2] * Ci).astype(jnp.bfloat16)

    # Fold BN (inference / running stats) scale into conv weights; build banded weights.
    s1, sh1 = _bn_scale_shift(params["bn1_gamma"], params["bn1_beta"],
                              params["bn1_mean"], params["bn1_var"])
    s2, sh2 = _bn_scale_shift(params["bn2_gamma"], params["bn2_beta"],
                              params["bn2_mean"], params["bn2_var"])
    w1_hwio = jnp.transpose(params["w1"], (2, 3, 1, 0)) * s1        # OIHW -> HWIO, scaled
    w2_hwio = jnp.transpose(params["w2"], (2, 3, 1, 0)) * s2
    # concat(x_up, skip) is fused by splitting conv1's contraction over its input channels
    b1 = jnp.concatenate([_band_conv3x3(w1_hwio[:, :, :Ci, :], Wo),
                          _band_conv3x3(w1_hwio[:, :, Ci:, :], Wo)],
                         axis=1).astype(jnp.bfloat16)               # (3, Wo*(Ci+Cs), Wo*Co)
    b2 = _band_conv3x3(w2_hwio, Wo).astype(jnp.bfloat16)            # (3, Wo*Co, Wo*Co)
    sh1_row = jnp.tile(sh1, Wo).reshape(1, Wo * Co).astype(jnp.float32)
    sh2_row = jnp.tile(sh2, Wo).reshape(1, Wo * Co).astype(jnp.float32)

    if has_upconv:
        bup_band = _band_upconv_rows(params["w_up"], Wo // 2).astype(jnp.bfloat16)
        bup_bias = jnp.tile(params["b_up"], Wo).reshape(1, Wo * Ci).astype(jnp.float32)
        inputs = (x_rows, skip_rows, bup_bias, bup_band, b1, sh1_row, b2, sh2_row)
    else:
        inputs = (x_rows, skip_rows, b1, sh1_row, b2, sh2_row)

    in_specs = [_batch_spec(x_rows.shape), _batch_spec(skip_rows.shape)]
    in_specs += [_rep_spec(a.shape) for a in inputs[2:]]

    kernel = functools.partial(_upsample_block_kernel, has_upconv=has_upconv)
    out_rows = pl.pallas_call(
        kernel,
        out_shape=jax.ShapeDtypeStruct((N, Ho, Wo * Co), jnp.float32),
        grid=(N,),
        in_specs=in_specs,
        out_specs=pl.BlockSpec((1, Ho, Wo * Co), lambda n: (n, 0, 0)),
        scratch_shapes=[
            pltpu.VMEM((Ho + 2, Wo * (Ci + Cs)), jnp.float32),   # [x_up | skip] + row halo
            pltpu.VMEM((Ho + 2, Wo * Co), jnp.float32),          # conv1 output  + row halo
        ],
        compiler_params=pltpu.CompilerParams(dimension_semantics=("parallel",)),
    )(*inputs)

    return jnp.transpose(out_rows.reshape(N, Ho, Wo, Co), (0, 3, 1, 2))  # -> NCHW


# ---------------------------------------------------------------------------
# Parameter init (deterministic, synthetic) — shapes match the PyTorch module.
# ---------------------------------------------------------------------------
def init_params(key, in_ch, skip_ch, out_ch):
    ks = jax.random.split(key, 12)
    p = {}
    # ConvTranspose2d(in_ch, in_ch, 3, stride=2, padding=1, output_padding=1)
    p["w_up"] = 0.1 * jax.random.normal(ks[0], (in_ch, in_ch, 3, 3), jnp.float32)
    p["b_up"] = 0.1 * jax.random.normal(ks[1], (in_ch,), jnp.float32)
    # Conv2d(in_ch + skip_ch, out_ch, 3, padding=1, bias=False) + BN
    p["w1"] = 0.1 * jax.random.normal(ks[2], (out_ch, in_ch + skip_ch, 3, 3), jnp.float32)
    p["bn1_gamma"] = 1.0 + 0.1 * jax.random.normal(ks[3], (out_ch,), jnp.float32)
    p["bn1_beta"] = 0.1 * jax.random.normal(ks[4], (out_ch,), jnp.float32)
    p["bn1_mean"] = 0.1 * jax.random.normal(ks[5], (out_ch,), jnp.float32)
    p["bn1_var"] = 0.5 + jnp.abs(jax.random.normal(ks[6], (out_ch,), jnp.float32))
    # Conv2d(out_ch, out_ch, 3, padding=1, bias=False) + BN
    p["w2"] = 0.1 * jax.random.normal(ks[7], (out_ch, out_ch, 3, 3), jnp.float32)
    p["bn2_gamma"] = 1.0 + 0.1 * jax.random.normal(ks[8], (out_ch,), jnp.float32)
    p["bn2_beta"] = 0.1 * jax.random.normal(ks[9], (out_ch,), jnp.float32)
    p["bn2_mean"] = 0.1 * jax.random.normal(ks[10], (out_ch,), jnp.float32)
    p["bn2_var"] = 0.5 + jnp.abs(jax.random.normal(ks[11], (out_ch,), jnp.float32))
    return p


# ---------------------------------------------------------------------------
# Pure-JAX reference (lax conv, f32) for verification.
# ---------------------------------------------------------------------------
def reference_forward(params, x_nchw, skip_nchw, is_upblock1=False):
    dn = ("NHWC", "HWIO", "NHWC")
    x = jnp.transpose(x_nchw, (0, 2, 3, 1))
    skip = jnp.transpose(skip_nchw, (0, 2, 3, 1))

    if not is_upblock1:
        w_up_hwio = jnp.transpose(params["w_up"][:, :, ::-1, ::-1], (2, 3, 0, 1))
        x = jax.lax.conv_general_dilated(
            x, w_up_hwio, window_strides=(1, 1),
            padding=((1, 2), (1, 2)), lhs_dilation=(2, 2),
            dimension_numbers=dn) + params["b_up"]

    x = jnp.concatenate([x, skip], axis=-1)

    def cbr(x, w_oihw, g, b, m, v):
        w = jnp.transpose(w_oihw, (2, 3, 1, 0))
        y = jax.lax.conv_general_dilated(x, w, (1, 1), ((1, 1), (1, 1)),
                                         dimension_numbers=dn)
        y = (y - m) / jnp.sqrt(v + _EPS) * g + b
        return jnp.maximum(y, 0.0)

    x = cbr(x, params["w1"], params["bn1_gamma"], params["bn1_beta"],
            params["bn1_mean"], params["bn1_var"])
    x = cbr(x, params["w2"], params["bn2_gamma"], params["bn2_beta"],
            params["bn2_mean"], params["bn2_var"])
    return jnp.transpose(x, (0, 3, 1, 2))


if __name__ == "__main__":
    key = jax.random.PRNGKey(0)
    kx, kx1, kskip, kp = jax.random.split(key, 4)

    N = 2
    in_ch, skip_ch, out_ch = 8, 8, 16
    H = W = 8  # decoder input spatial; skip is 2H x 2W

    x = jax.random.normal(kx, (N, in_ch, H, W), jnp.float32)
    skip_feature = jax.random.normal(kskip, (N, skip_ch, 2 * H, 2 * W), jnp.float32)
    params = init_params(kp, in_ch, skip_ch, out_ch)

    fwd = jax.jit(upsample_block_forward, static_argnames=("is_upblock1",))

    # --- regular decoder block (with ConvTranspose2d upsample) ---
    out = jax.block_until_ready(fwd(params, x, skip_feature, is_upblock1=False))
    assert out.shape == (N, out_ch, 2 * H, 2 * W), out.shape
    ref = jax.block_until_ready(
        reference_forward(params, x, skip_feature, is_upblock1=False))
    # bf16 MXU path vs f32 reference -> slightly looser tolerance than pure-f32.
    np.testing.assert_allclose(np.asarray(out), np.asarray(ref), rtol=4e-2, atol=4e-2)

    # --- is_upblock1=True path (no upsample, plain concat) ---
    x1 = jax.random.normal(kx1, (N, in_ch, 2 * H, 2 * W), jnp.float32)
    out1 = jax.block_until_ready(fwd(params, x1, skip_feature, is_upblock1=True))
    ref1 = jax.block_until_ready(
        reference_forward(params, x1, skip_feature, is_upblock1=True))
    np.testing.assert_allclose(np.asarray(out1), np.asarray(ref1), rtol=4e-2, atol=4e-2)

    print("KERNEL_OK")
</pallas_src>

<mosaic_0001>
module attributes {stable_mosaic.version = 11 : i64} {
  func.func @_upsample_block_kernel(%arg0: i32, %arg1: memref<1x8x64xbf16, #tpu.memory_space<vmem>>, %arg2: memref<1x16x128xbf16, #tpu.memory_space<vmem>>, %arg3: memref<1x128xf32, #tpu.memory_space<vmem>>, %arg4: memref<3x64x128xbf16, #tpu.memory_space<vmem>>, %arg5: memref<3x256x256xbf16, #tpu.memory_space<vmem>>, %arg6: memref<1x256xf32, #tpu.memory_space<vmem>>, %arg7: memref<3x256x256xbf16, #tpu.memory_space<vmem>>, %arg8: memref<1x256xf32, #tpu.memory_space<vmem>>, %arg9: memref<1x16x256xf32, #tpu.memory_space<vmem>>, %arg10: memref<18x256xf32, #tpu.memory_space<vmem>>, %arg11: memref<18x256xf32, #tpu.memory_space<vmem>>) attributes {dimension_semantics = [#tpu.dimension_semantics<parallel>], iteration_bounds = array<i64: 2>, scalar_prefetch = 0 : i64, scratch_operands = 2 : i64, tpu.core_type = #tpu.core_type<tc>, window_params = [{transform_indices = @transform_0, window_bounds = array<i64: 1, 8, 64>}, {transform_indices = @transform_1, window_bounds = array<i64: 1, 16, 128>}, {pipeline_mode = #tpu.pipeline_mode<synchronous>, transform_indices = @transform_2, window_bounds = array<i64: 1, 128>}, {pipeline_mode = #tpu.pipeline_mode<synchronous>, transform_indices = @transform_3, window_bounds = array<i64: 3, 64, 128>}, {pipeline_mode = #tpu.pipeline_mode<synchronous>, transform_indices = @transform_4, window_bounds = array<i64: 3, 256, 256>}, {pipeline_mode = #tpu.pipeline_mode<synchronous>, transform_indices = @transform_5, window_bounds = array<i64: 1, 256>}, {pipeline_mode = #tpu.pipeline_mode<synchronous>, transform_indices = @transform_6, window_bounds = array<i64: 3, 256, 256>}, {pipeline_mode = #tpu.pipeline_mode<synchronous>, transform_indices = @transform_7, window_bounds = array<i64: 1, 256>}, {transform_indices = @transform_8, window_bounds = array<i64: 1, 16, 256>}]} {
    %c0 = arith.constant 0 : index
    %c0_0 = arith.constant 0 : index
    %c0_1 = arith.constant 0 : index
    %0 = vector.load %arg1[%c0, %c0_0, %c0_1] : memref<1x8x64xbf16, #tpu.memory_space<vmem>>, vector<1x8x64xbf16>
    %1 = vector.shape_cast %0 : vector<1x8x64xbf16> to vector<8x64xbf16>
    %c0_2 = arith.constant 0 : index
    %c0_3 = arith.constant 0 : index
    %c0_4 = arith.constant 0 : index
    %2 = vector.load %arg4[%c0_2, %c0_3, %c0_4] : memref<3x64x128xbf16, #tpu.memory_space<vmem>>, vector<1x64x128xbf16>
    %3 = vector.shape_cast %2 : vector<1x64x128xbf16> to vector<64x128xbf16>
    %cst = arith.constant dense<0.000000e+00> : vector<8x128xf32>
    %4 = tpu.matmul %1, %3, %cst {dimension_numbers = #tpu.dot_dimension_numbers<[1], [0], [0], [1], [0, 0, 1, 1], [], []>} : vector<8x64xbf16>, vector<64x128xbf16>, vector<8x128xf32> -> vector<8x128xf32>
    %c1 = arith.constant 1 : index
    %c0_5 = arith.constant 0 : index
    %c0_6 = arith.constant 0 : index
    %5 = vector.load %arg4[%c1, %c0_5, %c0_6] : memref<3x64x128xbf16, #tpu.memory_space<vmem>>, vector<1x64x128xbf16>
    %6 = vector.shape_cast %5 : vector<1x64x128xbf16> to vector<64x128xbf16>
    %cst_7 = arith.constant dense<0.000000e+00> : vector<8x128xf32>
    %7 = tpu.matmul %1, %6, %cst_7 {dimension_numbers = #tpu.dot_dimension_numbers<[1], [0], [0], [1], [0, 0, 1, 1], [], []>} : vector<8x64xbf16>, vector<64x128xbf16>, vector<8x128xf32> -> vector<8x128xf32>
    %c2 = arith.constant 2 : index
    %c0_8 = arith.constant 0 : index
    %c0_9 = arith.constant 0 : index
    %8 = vector.load %arg4[%c2, %c0_8, %c0_9] : memref<3x64x128xbf16, #tpu.memory_space<vmem>>, vector<1x64x128xbf16>
    %9 = vector.shape_cast %8 : vector<1x64x128xbf16> to vector<64x128xbf16>
    %cst_10 = arith.constant dense<0.000000e+00> : vector<8x128xf32>
    %10 = tpu.matmul %1, %9, %cst_10 {dimension_numbers = #tpu.dot_dimension_numbers<[1], [0], [0], [1], [0, 0, 1, 1], [], []>} : vector<8x64xbf16>, vector<64x128xbf16>, vector<8x128xf32> -> vector<8x128xf32>
    %11 = tpu.iota {dimensions = array<i32: 0>} : vector<16x8xi32>
    %12 = tpu.iota {dimensions = array<i32: 1>} : vector<16x8xi32>
    %c2_i32 = arith.constant 2 : i32
    %13 = vector.broadcast %c2_i32 : i32 to vector<16x8xi32>
    %14 = arith.muli %13, %12 : vector<16x8xi32>
    %15 = arith.cmpi eq, %11, %14 : vector<16x8xi32>
    %16 = arith.extui %15 : vector<16x8xi1> to vector<16x8xi32>
    %17 = arith.sitofp %16 : vector<16x8xi32> to vector<16x8xf32>
    %cst_11 = arith.constant dense<0.000000e+00> : vector<16x128xf32>
    %18 = tpu.matmul %17, %4, %cst_11 {dimension_numbers = #tpu.dot_dimension_numbers<[1], [0], [0], [1], [0, 0, 1, 1], [], []>} : vector<16x8xf32>, vector<8x128xf32>, vector<16x128xf32> -> vector<16x128xf32>
    %c2_i32_12 = arith.constant 2 : i32
    %19 = vector.broadcast %c2_i32_12 : i32 to vector<16x8xi32>
    %20 = arith.muli %19, %12 : vector<16x8xi32>
    %c1_i32 = arith.constant 1 : i32
    %21 = vector.broadcast %c1_i32 : i32 to vector<16x8xi32>
    %22 = arith.addi %20, %21 : vector<16x8xi32>
    %23 = arith.cmpi eq, %11, %22 : vector<16x8xi32>
    %24 = arith.extui %23 : vector<16x8xi1> to vector<16x8xi32>
    %25 = arith.sitofp %24 : vector<16x8xi32> to vector<16x8xf32>
    %cst_13 = arith.constant dense<0.000000e+00> : vector<16x128xf32>
    %26 = tpu.matmul %25, %7, %cst_13 {dimension_numbers = #tpu.dot_dimension_numbers<[1], [0], [0], [1], [0, 0, 1, 1], [], []>} : vector<16x8xf32>, vector<8x128xf32>, vector<16x128xf32> -> vector<16x128xf32>
    %27 = arith.addf %18, %26 : vector<16x128xf32>
    %c2_i32_14 = arith.constant 2 : i32
    %28 = vector.broadcast %c2_i32_14 : i32 to vector<16x8xi32>
    %29 = arith.muli %28, %12 : vector<16x8xi32>
    %c1_i32_15 = arith.constant 1 : i32
    %30 = vector.broadcast %c1_i32_15 : i32 to vector<16x8xi32>
    %31 = arith.subi %29, %30 : vector<16x8xi32>
    %32 = arith.cmpi eq, %11, %31 : vector<16x8xi32>
    %33 = arith.extui %32 : vector<16x8xi1> to vector<16x8xi32>
    %34 = arith.sitofp %33 : vector<16x8xi32> to vector<16x8xf32>
    %cst_16 = arith.constant dense<0.000000e+00> : vector<16x128xf32>
    %35 = tpu.matmul %34, %10, %cst_16 {dimension_numbers = #tpu.dot_dimension_numbers<[1], [0], [0], [1], [0, 0, 1, 1], [], []>} : vector<16x8xf32>, vector<8x128xf32>, vector<16x128xf32> -> vector<16x128xf32>
    %36 = arith.addf %27, %35 : vector<16x128xf32>
    %c0_17 = arith.constant 0 : index
    %c0_18 = arith.constant 0 : index
    %37 = vector.load %arg3[%c0_17, %c0_18] : memref<1x128xf32, #tpu.memory_space<vmem>>, vector<1x128xf32>
    %38 = vector.broadcast %37 : vector<1x128xf32> to vector<16x128xf32>
    %39 = arith.addf %36, %38 : vector<16x128xf32>
    %cst_19 = arith.constant 0.000000e+00 : f32
    %40 = vector.broadcast %cst_19 : f32 to vector<1x256xf32>
    %c0_20 = arith.constant 0 : index
    %c0_21 = arith.constant 0 : index
    %41 = vector.load %arg10[%c0_20, %c0_21] : memref<18x256xf32, #tpu.memory_space<vmem>>, vector<1x256xf32>
    tpu.vector_store %arg10[%c0_20, %c0_21], %40 {strides = array<i32>} : memref<18x256xf32, #tpu.memory_space<vmem>>, vector<1x256xf32>,
    %c17 = arith.constant 17 : index
    %c0_22 = arith.constant 0 : index
    %42 = vector.load %arg10[%c17, %c0_22] : memref<18x256xf32, #tpu.memory_space<vmem>>, vector<1x256xf32>
    tpu.vector_store %arg10[%c17, %c0_22], %40 {strides = array<i32>} : memref<18x256xf32, #tpu.memory_space<vmem>>, vector<1x256xf32>,
    %c0_23 = arith.constant 0 : index
    %c0_24 = arith.constant 0 : index
    %c0_25 = arith.constant 0 : index
    %43 = vector.load %arg2[%c0_23, %c0_24, %c0_25] : memref<1x16x128xbf16, #tpu.memory_space<vmem>>, vector<1x16x128xbf16>
    %44 = vector.shape_cast %43 : vector<1x16x128xbf16> to vector<16x128xbf16>
    %45 = arith.extf %44 : vector<16x128xbf16> to vector<16x128xf32>
    %46 = tpu.concatenate %39, %45 in 1 : vector<16x128xf32>, vector<16x128xf32> -> vector<16x256xf32>
    %c1_26 = arith.constant 1 : index
    %c0_27 = arith.constant 0 : index
    %47 = vector.load %arg10[%c1_26, %c0_27] : memref<18x256xf32, #tpu.memory_space<vmem>>, vector<16x256xf32>
    tpu.vector_store %arg10[%c1_26, %c0_27], %46 {strides = array<i32>} : memref<18x256xf32, #tpu.memory_space<vmem>>, vector<16x256xf32>,
    %c0_28 = arith.constant 0 : index
    %c0_29 = arith.constant 0 : index
    %48 = vector.load %arg10[%c0_28, %c0_29] : memref<18x256xf32, #tpu.memory_space<vmem>>, vector<16x256xf32>
    %49 = arith.truncf %48 : vector<16x256xf32> to vector<16x256xbf16>
    %c0_30 = arith.constant 0 : index
    %c0_31 = arith.constant 0 : index
    %c0_32 = arith.constant 0 : index
    %50 = vector.load %arg5[%c0_30, %c0_31, %c0_32] : memref<3x256x256xbf16, #tpu.memory_space<vmem>>, vector<1x256x256xbf16>
    %51 = vector.shape_cast %50 : vector<1x256x256xbf16> to vector<256x256xbf16>
    %cst_33 = arith.constant dense<0.000000e+00> : vector<16x256xf32>
    %52 = tpu.matmul %49, %51, %cst_33 {dimension_numbers = #tpu.dot_dimension_numbers<[1], [0], [0], [1], [0, 0, 1, 1], [], []>} : vector<16x256xbf16>, vector<256x256xbf16>, vector<16x256xf32> -> vector<16x256xf32>
    %c1_34 = arith.constant 1 : index
    %c0_35 = arith.constant 0 : index
    %53 = vector.load %arg10[%c1_34, %c0_35] : memref<18x256xf32, #tpu.memory_space<vmem>>, vector<16x256xf32>
    %54 = arith.truncf %53 : vector<16x256xf32> to vector<16x256xbf16>
    %c1_36 = arith.constant 1 : index
    %c0_37 = arith.constant 0 : index
    %c0_38 = arith.constant 0 : index
    %55 = vector.load %arg5[%c1_36, %c0_37, %c0_38] : memref<3x256x256xbf16, #tpu.memory_space<vmem>>, vector<1x256x256xbf16>
    %56 = vector.shape_cast %55 : vector<1x256x256xbf16> to vector<256x256xbf16>
    %cst_39 = arith.constant dense<0.000000e+00> : vector<16x256xf32>
    %57 = tpu.matmul %54, %56, %cst_39 {dimension_numbers = #tpu.dot_dimension_numbers<[1], [0], [0], [1], [0, 0, 1, 1], [], []>} : vector<16x256xbf16>, vector<256x256xbf16>, vector<16x256xf32> -> vector<16x256xf32>
    %58 = arith.addf %52, %57 : vector<16x256xf32>
    %c2_40 = arith.constant 2 : index
    %c0_41 = arith.constant 0 : index
    %59 = vector.load %arg10[%c2_40, %c0_41] : memref<18x256xf32, #tpu.memory_space<vmem>>, vector<16x256xf32>
    %60 = arith.truncf %59 : vector<16x256xf32> to vector<16x256xbf16>
    %c2_42 = arith.constant 2 : index
    %c0_43 = arith.constant 0 : index
    %c0_44 = arith.constant 0 : index
    %61 = vector.load %arg5[%c2_42, %c0_43, %c0_44] : memref<3x256x256xbf16, #tpu.memory_space<vmem>>, vector<1x256x256xbf16>
    %62 = vector.shape_cast %61 : vector<1x256x256xbf16> to vector<256x256xbf16>
    %cst_45 = arith.constant dense<0.000000e+00> : vector<16x256xf32>
    %63 = tpu.matmul %60, %62, %cst_45 {dimension_numbers = #tpu.dot_dimension_numbers<[1], [0], [0], [1], [0, 0, 1, 1], [], []>} : vector<16x256xbf16>, vector<256x256xbf16>, vector<16x256xf32> -> vector<16x256xf32>
    %64 = arith.addf %58, %63 : vector<16x256xf32>
    %c0_46 = arith.constant 0 : index
    %c0_47 = arith.constant 0 : index
    %65 = vector.load %arg6[%c0_46, %c0_47] : memref<1x256xf32, #tpu.memory_space<vmem>>, vector<1x256xf32>
    %66 = vector.broadcast %65 : vector<1x256xf32> to vector<16x256xf32>
    %67 = arith.addf %64, %66 : vector<16x256xf32>
    %cst_48 = arith.constant 0.000000e+00 : f32
    %68 = vector.broadcast %cst_48 : f32 to vector<16x256xf32>
    %69 = arith.maximumf %67, %68 : vector<16x256xf32>
    %cst_49 = arith.constant 0.000000e+00 : f32
    %70 = vector.broadcast %cst_49 : f32 to vector<1x256xf32>
    %c0_50 = arith.constant 0 : index
    %c0_51 = arith.constant 0 : index
    %71 = vector.load %arg11[%c0_50, %c0_51] : memref<18x256xf32, #tpu.memory_space<vmem>>, vector<1x256xf32>
    tpu.vector_store %arg11[%c0_50, %c0_51], %70 {strides = array<i32>} : memref<18x256xf32, #tpu.memory_space<vmem>>, vector<1x256xf32>,
    %c17_52 = arith.constant 17 : index
    %c0_53 = arith.constant 0 : index
    %72 = vector.load %arg11[%c17_52, %c0_53] : memref<18x256xf32, #tpu.memory_space<vmem>>, vector<1x256xf32>
    tpu.vector_store %arg11[%c17_52, %c0_53], %70 {strides = array<i32>} : memref<18x256xf32, #tpu.memory_space<vmem>>, vector<1x256xf32>,
    %c1_54 = arith.constant 1 : index
    %c0_55 = arith.constant 0 : index
    %73 = vector.load %arg11[%c1_54, %c0_55] : memref<18x256xf32, #tpu.memory_space<vmem>>, vector<16x256xf32>
    tpu.vector_store %arg11[%c1_54, %c0_55], %69 {strides = array<i32>} : memref<18x256xf32, #tpu.memory_space<vmem>>, vector<16x256xf32>,
    %c0_56 = arith.constant 0 : index
    %c0_57 = arith.constant 0 : index
    %74 = vector.load %arg11[%c0_56, %c0_57] : memref<18x256xf32, #tpu.memory_space<vmem>>, vector<16x256xf32>
    %75 = arith.truncf %74 : vector<16x256xf32> to vector<16x256xbf16>
    %c0_58 = arith.constant 0 : index
    %c0_59 = arith.constant 0 : index
    %c0_60 = arith.constant 0 : index
    %76 = vector.load %arg7[%c0_58, %c0_59, %c0_60] : memref<3x256x256xbf16, #tpu.memory_space<vmem>>, vector<1x256x256xbf16>
    %77 = vector.shape_cast %76 : vector<1x256x256xbf16> to vector<256x256xbf16>
    %cst_61 = arith.constant dense<0.000000e+00> : vector<16x256xf32>
    %78 = tpu.matmul %75, %77, %cst_61 {dimension_numbers = #tpu.dot_dimension_numbers<[1], [0], [0], [1], [0, 0, 1, 1], [], []>} : vector<16x256xbf16>, vector<256x256xbf16>, vector<16x256xf32> -> vector<16x256xf32>
    %c1_62 = arith.constant 1 : index
    %c0_63 = arith.constant 0 : index
    %79 = vector.load %arg11[%c1_62, %c0_63] : memref<18x256xf32, #tpu.memory_space<vmem>>, vector<16x256xf32>
    %80 = arith.truncf %79 : vector<16x256xf32> to vector<16x256xbf16>
    %c1_64 = arith.constant 1 : index
    %c0_65 = arith.constant 0 : index
    %c0_66 = arith.constant 0 : index
    %81 = vector.load %arg7[%c1_64, %c0_65, %c0_66] : memref<3x256x256xbf16, #tpu.memory_space<vmem>>, vector<1x256x256xbf16>
    %82 = vector.shape_cast %81 : vector<1x256x256xbf16> to vector<256x256xbf16>
    %cst_67 = arith.constant dense<0.000000e+00> : vector<16x256xf32>
    %83 = tpu.matmul %80, %82, %cst_67 {dimension_numbers = #tpu.dot_dimension_numbers<[1], [0], [0], [1], [0, 0, 1, 1], [], []>} : vector<16x256xbf16>, vector<256x256xbf16>, vector<16x256xf32> -> vector<16x256xf32>
    %84 = arith.addf %78, %83 : vector<16x256xf32>
    %c2_68 = arith.constant 2 : index
    %c0_69 = arith.constant 0 : index
    %85 = vector.load %arg11[%c2_68, %c0_69] : memref<18x256xf32, #tpu.memory_space<vmem>>, vector<16x256xf32>
    %86 = arith.truncf %85 : vector<16x256xf32> to vector<16x256xbf16>
    %c2_70 = arith.constant 2 : index
    %c0_71 = arith.constant 0 : index
    %c0_72 = arith.constant 0 : index
    %87 = vector.load %arg7[%c2_70, %c0_71, %c0_72] : memref<3x256x256xbf16, #tpu.memory_space<vmem>>, vector<1x256x256xbf16>
    %88 = vector.shape_cast %87 : vector<1x256x256xbf16> to vector<256x256xbf16>
    %cst_73 = arith.constant dense<0.000000e+00> : vector<16x256xf32>
    %89 = tpu.matmul %86, %88, %cst_73 {dimension_numbers = #tpu.dot_dimension_numbers<[1], [0], [0], [1], [0, 0, 1, 1], [], []>} : vector<16x256xbf16>, vector<256x256xbf16>, vector<16x256xf32> -> vector<16x256xf32>
    %90 = arith.addf %84, %89 : vector<16x256xf32>
    %c0_74 = arith.constant 0 : index
    %c0_75 = arith.constant 0 : index
    %91 = vector.load %arg8[%c0_74, %c0_75] : memref<1x256xf32, #tpu.memory_space<vmem>>, vector<1x256xf32>
    %92 = vector.broadcast %91 : vector<1x256xf32> to vector<16x256xf32>
    %93 = arith.addf %90, %92 : vector<16x256xf32>
    %cst_76 = arith.constant 0.000000e+00 : f32
    %94 = vector.broadcast %cst_76 : f32 to vector<16x256xf32>
    %95 = arith.maximumf %93, %94 : vector<16x256xf32>
    %c0_77 = arith.constant 0 : index
    %c0_78 = arith.constant 0 : index
    %c0_79 = arith.constant 0 : index
    %96 = vector.load %arg9[%c0_77, %c0_78, %c0_79] : memref<1x16x256xf32, #tpu.memory_space<vmem>>, vector<1x16x256xf32>
    %97 = vector.shape_cast %96 : vector<1x16x256xf32> to vector<16x256xf32>
    %98 = vector.shape_cast %95 : vector<16x256xf32> to vector<1x16x256xf32>
    tpu.vector_store %arg9[%c0_77, %c0_78, %c0_79], %98 {strides = array<i32>} : memref<1x16x256xf32, #tpu.memory_space<vmem>>, vector<1x16x256xf32>,
    return
  }
  func.func @transform_0(%arg0: i32) -> (i32, i32, i32) {
    %c0_i32 = arith.constant 0 : i32
    %c0_i32_0 = arith.constant 0 : i32
    %c0_i32_1 = arith.constant 0 : i32
    return %arg0, %c0_i32, %c0_i32_0 : i32, i32, i32
  }
  func.func @transform_1(%arg0: i32) -> (i32, i32, i32) {
    %c0_i32 = arith.constant 0 : i32
    %c0_i32_0 = arith.constant 0 : i32
    %c0_i32_1 = arith.constant 0 : i32
    return %arg0, %c0_i32, %c0_i32_0 : i32, i32, i32
  }
  func.func @transform_2(%arg0: i32) -> (i32, i32) {
    %c0_i32 = arith.constant 0 : i32
    %c0_i32_0 = arith.constant 0 : i32
    %c0_i32_1 = arith.constant 0 : i32
    return %c0_i32, %c0_i32_0 : i32, i32
  }
  func.func @transform_3(%arg0: i32) -> (i32, i32, i32) {
    %c0_i32 = arith.constant 0 : i32
    %c0_i32_0 = arith.constant 0 : i32
    %c0_i32_1 = arith.constant 0 : i32
    %c0_i32_2 = arith.constant 0 : i32
    return %c0_i32, %c0_i32_0, %c0_i32_1 : i32, i32, i32
  }
  func.func @transform_4(%arg0: i32) -> (i32, i32, i32) {
    %c0_i32 = arith.constant 0 : i32
    %c0_i32_0 = arith.constant 0 : i32
    %c0_i32_1 = arith.constant 0 : i32
    %c0_i32_2 = arith.constant 0 : i32
    return %c0_i32, %c0_i32_0, %c0_i32_1 : i32, i32, i32
  }
  func.func @transform_5(%arg0: i32) -> (i32, i32) {
    %c0_i32 = arith.constant 0 : i32
    %c0_i32_0 = arith.constant 0 : i32
    %c0_i32_1 = arith.constant 0 : i32
    return %c0_i32, %c0_i32_0 : i32, i32
  }
  func.func @transform_6(%arg0: i32) -> (i32, i32, i32) {
    %c0_i32 = arith.constant 0 : i32
    %c0_i32_0 = arith.constant 0 : i32
    %c0_i32_1 = arith.constant 0 : i32
    %c0_i32_2 = arith.constant 0 : i32
    return %c0_i32, %c0_i32_0, %c0_i32_1 : i32, i32, i32
  }
  func.func @transform_7(%arg0: i32) -> (i32, i32) {
    %c0_i32 = arith.constant 0 : i32
    %c0_i32_0 = arith.constant 0 : i32
    %c0_i32_1 = arith.constant 0 : i32
    return %c0_i32, %c0_i32_0 : i32, i32
  }
  func.func @transform_8(%arg0: i32) -> (i32, i32, i32) {
    %c0_i32 = arith.constant 0 : i32
    %c0_i32_0 = arith.constant 0 : i32
    %c0_i32_1 = arith.constant 0 : i32
    return %arg0, %c0_i32, %c0_i32_0 : i32, i32, i32
  }
}

</mosaic_0001>

<bundles_post_ra>
// kernel: tile.18
= control target key start
LH: loop header
LB: loop body
LE: loop exit
PB: predicated region body
PF: predicated region fallthrough
CT: control target
= control target key end

     0   :  { %s28_s0 = inlined_call_operand.vmem [shape: f32[16], index: 0, kind: input, shape index: {}]   ;;  %s29_s1 = inlined_call_operand.vmem [shape: f32[16,16], index: 1, kind: output, shape index: {}]  }
   0x1   :  { %v4_v0 = vld [vmem:[%s28_s0] ss:$0 sm:$0xff] }
   0x2   :  { %5 = vst [vmem:[%s29_s1] sm:$0xff] %v4_v0 }
   0x3   :  { %8 = vst [vmem:[%s29_s1 + $0x8] sm:$0xff] %v4_v0 }

// kernel: tile.19
= control target key start
LH: loop header
LB: loop body
LE: loop exit
PB: predicated region body
PF: predicated region fallthrough
CT: control target
= control target key end

     0   :  { %s7_s6 = smov 3  ;;  %s21_s9 = smov 3  ;;  %vm4_vm0 = vcmask 130048   ;;  %vm11_vm1 = vcmask 1048448   ;;  %vm18_vm2 = vcmask 917248   ;;  %vm25_vm3 = vcmask 786048   ;;  %s129_s0 = inlined_call_operand.vmem [shape: f32[16,16], index: 0, kind: input, shape index: {}]   ;;  %s130_s1 = inlined_call_operand.vmem [shape: f32[1,256], index: 1, kind: output, shape index: {}]  }
   0x1   :  { %v67_v0 = vld [vmem:[%s129_s0 + $0x7] ss:$8 sm:%s7_s6]   ;;  %s82_s10 = smov 112   ;;  %v69_v1 = vld [vmem:[%s129_s0 + $0x5] ss:$8 sm:%s21_s9]   ;;  %s83_s13 = smov 80  }
   0x2   :  { %9 = vrot.lane.b32.xlu0 %v67_v0, %s82_s10  ;;  %23 = vrot.lane.b32.xlu1 %v69_v1, %s83_s13  ;;  %s14_s14 = smov 3  ;;  %s28_s15 = smov 3  ;;  %vm32_vm4 = vcmask 654848   ;;  %vm39_vm5 = vcmask 523648   ;;  %vm46_vm6 = vcmask 392448   ;;  %vm53_vm7 = vcmask 261248  }
   0x3   :  { %s35_s16 = smov 3  ;;  %v68_v3 = vld [vmem:[%s129_s0 + $0x6] ss:$8 sm:%s14_s14]   ;;  %s84_s21 = smov 48   ;;  %v70_v4 = vld [vmem:[%s129_s0 + $0x4] ss:$8 sm:%s28_s15]  }
   0x4   :  { %v71_v2 = vld [vmem:[%s129_s0 + $0x3] ss:$8 sm:%s35_s16]   ;;  %s42_s24 = smov 3  ;;  %s85_s25 = smov 96  }
   0x5   :  { %37 = vrot.lane.b32.xlu2 %v71_v2, %s84_s21  ;;  %s86_s26 = smov 64   ;;  %s49_s27 = smov 3  ;;  %v72_v5 = vld [vmem:[%s129_s0 + $0x2] ss:$8 sm:%s42_s24]  }
   0x6   :  { %v73_v6 = vld [vmem:[%s129_s0 + $0x1] ss:$8 sm:%s49_s27]   ;;  %s87_s3 = smov 32   ;;  %s88_s4 = smov 16  }
   0x7   :  { %s2_s5 = smov 3 }
   0x8   :  { %v3_v7 = vld [vmem:[%s129_s0] ss:$8 sm:%s2_s5]  }
   0x9   :  { %5 = vst.msk [vmem:[#allocation0] ss:$8 sm:$0x3] %vm4_vm0, %v3_v7  }
   0xa   :  { %16 = vrot.lane.b32.xlu0 %v68_v3, %s85_s25  ;;  %30 = vrot.lane.b32.xlu1 %v70_v4, %s86_s26 }
   0xd   :  { %44 = vrot.lane.b32.xlu2 %v72_v5, %s87_s3 }
  0x12   :  { %51 = vrot.lane.b32.xlu0 %v73_v6, %s88_s4 }
  0x5f   :  { %v38_v8 = vpop.permute.xlu2 %37  }
  0x67   :  { %v45_v9 = vpop.permute.xlu2 %44  }
  0x74   :  { %v10_v10 = vpop.permute.xlu0 %9   ;;  %v24_v11 = vpop.permute.xlu1 %23  }
  0x75   :  { %12 = vst.msk [vmem:[#allocation0] ss:$8 sm:$0x3] %vm11_vm1, %v10_v10  }
  0x7c   :  { %v17_v12 = vpop.permute.xlu0 %16   ;;  %v31_v13 = vpop.permute.xlu1 %30  }
  0x7d   :  { %19 = vst.msk [vmem:[#allocation0] ss:$8 sm:$0x3] %vm18_vm2, %v17_v12  }
  0x7e   :  { %26 = vst.msk [vmem:[#allocation0] ss:$8 sm:$0x3] %vm25_vm3, %v24_v11  }
  0x7f   :  { %33 = vst.msk [vmem:[#allocation0] ss:$8 sm:$0x3] %vm32_vm4, %v31_v13  }
  0x80   :  { %40 = vst.msk [vmem:[#allocation0] ss:$8 sm:$0x3] %vm39_vm5, %v38_v8  }
  0x81   :  { %47 = vst.msk [vmem:[#allocation0] ss:$8 sm:$0x3] %vm46_vm6, %v45_v9  }
  0x84   :  { %v52_v14 = vpop.permute.xlu0 %51  }
  0x85   :  { %54 = vst.msk [vmem:[#allocation0] ss:$8 sm:$0x3] %vm53_vm7, %v52_v14  }
  0x8c   :  { %v57_v15 = vld [vmem:[#allocation0] sm:$0x1]  ;;  %v62_v16 = vld [vmem:[#allocation0 + $0x8] sm:$0x1] }
  0x8d   :  { %60 = vst [vmem:[%s130_s1] sm:$0x1] %v57_v15 }
  0x8e   :  { %74 = vst [vmem:[%s130_s1 + $0x1] sm:$0x1] %v62_v16 }

// kernel: tile.28
= control target key start
LH: loop header
LB: loop body
LE: loop exit
PB: predicated region body
PF: predicated region fallthrough
CT: control target
= control target key end

     0   :  { %s28_s0 = inlined_call_operand.vmem [shape: f32[8], index: 0, kind: input, shape index: {}]   ;;  %s29_s1 = inlined_call_operand.vmem [shape: f32[16,8], index: 1, kind: output, shape index: {}]  }
   0x1   :  { %v4_v0 = vld [vmem:[%s28_s0] ss:$0 sm:$0xff] }
   0x2   :  { %5 = vst [vmem:[%s29_s1] sm:$0xff] %v4_v0 }
   0x3   :  { %8 = vst [vmem:[%s29_s1 + $0x8] sm:$0xff] %v4_v0 }

// kernel: tile.29
= control target key start
LH: loop header
LB: loop body
LE: loop exit
PB: predicated region body
PF: predicated region fallthrough
CT: control target
= control target key end

     0   :  { %s131_s10 = smov 120   ;;  %s132_s11 = smov 104   ;;  %vm3_vm0 = vcmask 64512   ;;  %vm9_vm1 = vcmask 1048512   ;;  %vm15_vm2 = vcmask 982912   ;;  %vm21_vm3 = vcmask 917312   ;;  %s207_s0 = inlined_call_operand.vmem [shape: f32[16,8], index: 0, kind: input, shape index: {}]   ;;  %s208_s1 = inlined_call_operand.vmem [shape: f32[1,128], index: 1, kind: output, shape index: {}]  }
   0x1   :  { %v101_v0 = vld [vmem:[%s207_s0 + $0xf] sm:$0x1]   ;;  %v103_v1 = vld [vmem:[%s207_s0 + $0xd] sm:$0x1]   ;;  %v105_v2 = vld [vmem:[%s207_s0 + $0xb] sm:$0x1]  }
   0x2   :  { %7 = vrot.lane.b32.xlu0 %v101_v0, %s131_s10  ;;  %19 = vrot.lane.b32.xlu1 %v103_v1, %s132_s11  ;;  %s133_s14 = smov 88   ;;  %v102_v3 = vld [vmem:[%s207_s0 + $0xe] sm:$0x1]   ;;  %v104_v4 = vld [vmem:[%s207_s0 + $0xc] sm:$0x1]   ;;  %s134_s19 = smov 112  }
   0x3   :  { %31 = vrot.lane.b32.xlu2 %v105_v2, %s133_s14  ;;  %s135_s20 = smov 96   ;;  %v106_v5 = vld [vmem:[%s207_s0 + $0xa] sm:$0x1]   ;;  %s136_s23 = smov 80   ;;  %v107_v6 = vld [vmem:[%s207_s0 + $0x9] sm:$0x1]  }
   0x4   :  { %v108_v7 = vld [vmem:[%s207_s0 + $0x8] sm:$0x1]   ;;  %s137_s28 = smov 72   ;;  %s138_s29 = smov 64   ;;  %v109_v8 = vld [vmem:[%s207_s0 + $0x7] sm:$0x1]  }
   0x5   :  { %s139_s3 = smov 56   ;;  %v110_v9 = vld [vmem:[%s207_s0 + $0x6] sm:$0x1]   ;;  %v111_v10 = vld [vmem:[%s207_s0 + $0x5] sm:$0x1]   ;;  %s140_s8 = smov 48  }
   0x6   :  { %s141_s9 = smov 40   ;;  %v112_v11 = vld [vmem:[%s207_s0 + $0x4] sm:$0x1]   ;;  %s142_s12 = smov 32   ;;  %v113_v12 = vld [vmem:[%s207_s0 + $0x3] sm:$0x1]  }
   0x7   :  { %v114_v13 = vld [vmem:[%s207_s0 + $0x2] sm:$0x1]   ;;  %s143_s17 = smov 24   ;;  %s144_s18 = smov 16   ;;  %v115_v14 = vld [vmem:[%s207_s0 + $0x1] sm:$0x1]  }
   0x8   :  { %s145_s21 = smov 8   ;;  %v2_v15 = vld [vmem:[%s207_s0] sm:$0x1]   ;;  %vm27_vm4 = vcmask 851712   ;;  %vm33_vm5 = vcmask 786112   ;;  %vm39_vm6 = vcmask 720512  }
   0x9   :  { %4 = vst.msk [vmem:[#allocation0] sm:$0x1] %vm3_vm0, %v2_v15   ;;  %vm45_vm7 = vcmask 654912   ;;  %vm51_vm8 = vcmask 589312   ;;  %vm57_vm9 = vcmask 523712   ;;  %vm63_vm10 = vcmask 458112  }
   0xa   :  { %13 = vrot.lane.b32.xlu0 %v102_v3, %s134_s19  ;;  %25 = vrot.lane.b32.xlu1 %v104_v4, %s135_s20  ;;  %vm69_vm11 = vcmask 392512   ;;  %vm75_vm12 = vcmask 326912   ;;  %vm81_vm13 = vcmask 261312   ;;  %vm87_vm14 = vcmask 195712  }
   0xb   :  { %37 = vrot.lane.b32.xlu2 %v106_v5, %s136_s23  ;;  %vm93_vm15 = vcmask 130112  }
  0x12   :  { %43 = vrot.lane.b32.xlu0 %v107_v6, %s137_s28  ;;  %49 = vrot.lane.b32.xlu1 %v108_v7, %s138_s29 }
  0x13   :  { %55 = vrot.lane.b32.xlu2 %v109_v8, %s139_s3 }
  0x1a   :  { %61 = vrot.lane.b32.xlu0 %v110_v9, %s140_s8  ;;  %67 = vrot.lane.b32.xlu1 %v111_v10, %s141_s9 }
  0x1b   :  { %73 = vrot.lane.b32.xlu2 %v112_v11, %s142_s12 }
  0x22   :  { %79 = vrot.lane.b32.xlu0 %v113_v12, %s143_s17  ;;  %85 = vrot.lane.b32.xlu1 %v114_v13, %s144_s18 }
  0x23   :  { %91 = vrot.lane.b32.xlu2 %v115_v14, %s145_s21 }
  0x5d   :  { %v32_v16 = vpop.permute.xlu2 %31  }
  0x65   :  { %v38_v17 = vpop.permute.xlu2 %37  }
  0x6d   :  { %v56_v18 = vpop.permute.xlu2 %55  }
  0x74   :  { %v8_v19 = vpop.permute.xlu0 %7   ;;  %v20_v20 = vpop.permute.xlu1 %19  }
  0x75   :  { %10 = vst.msk [vmem:[#allocation0] sm:$0x1] %vm9_vm1, %v8_v19   ;;  %v74_v21 = vpop.permute.xlu2 %73  }
  0x7c   :  { %v14_v22 = vpop.permute.xlu0 %13   ;;  %v26_v23 = vpop.permute.xlu1 %25  }
  0x7d   :  { %16 = vst.msk [vmem:[#allocation0] sm:$0x1] %vm15_vm2, %v14_v22   ;;  %v92_v24 = vpop.permute.xlu2 %91  }
  0x7e   :  { %22 = vst.msk [vmem:[#allocation0] sm:$0x1] %vm21_vm3, %v20_v20  }
  0x7f   :  { %28 = vst.msk [vmem:[#allocation0] sm:$0x1] %vm27_vm4, %v26_v23  }
  0x80   :  { %34 = vst.msk [vmem:[#allocation0] sm:$0x1] %vm33_vm5, %v32_v16  }
  0x81   :  { %40 = vst.msk [vmem:[#allocation0] sm:$0x1] %vm39_vm6, %v38_v17  }
  0x84   :  { %v44_v25 = vpop.permute.xlu0 %43   ;;  %v50_v26 = vpop.permute.xlu1 %49  }
  0x85   :  { %46 = vst.msk [vmem:[#allocation0] sm:$0x1] %vm45_vm7, %v44_v25  }
  0x86   :  { %52 = vst.msk [vmem:[#allocation0] sm:$0x1] %vm51_vm8, %v50_v26  }
  0x87   :  { %58 = vst.msk [vmem:[#allocation0] sm:$0x1] %vm57_vm9, %v56_v18  }
  0x8c   :  { %v62_v27 = vpop.permute.xlu0 %61   ;;  %v68_v28 = vpop.permute.xlu1 %67  }
  0x8d   :  { %64 = vst.msk [vmem:[#allocation0] sm:$0x1] %vm63_vm10, %v62_v27  }
  0x8e   :  { %70 = vst.msk [vmem:[#allocation0] sm:$0x1] %vm69_vm11, %v68_v28  }
  0x8f   :  { %76 = vst.msk [vmem:[#allocation0] sm:$0x1] %vm75_vm12, %v74_v21  }
  0x94   :  { %v80_v29 = vpop.permute.xlu0 %79   ;;  %v86_v30 = vpop.permute.xlu1 %85  }
  0x95   :  { %82 = vst.msk [vmem:[#allocation0] sm:$0x1] %vm81_vm13, %v80_v29  }
  0x96   :  { %88 = vst.msk [vmem:[#allocation0] sm:$0x1] %vm87_vm14, %v86_v30  }
  0x97   :  { %94 = vst.msk [vmem:[#allocation0] sm:$0x1] %vm93_vm15, %v92_v24  }
  0x9e   :  { %v97_v31 = vld [vmem:[#allocation0] sm:$0x1] }
  0x9f   :  { %100 = vst [vmem:[%s208_s1] sm:$0x1] %v97_v31 }

// kernel: upsample_block_forward.1
= control target key start
LH: loop header
LB: loop body
LE: loop exit
PB: predicated region body
PF: predicated region fallthrough
CT: control target
= control target key end

     0   :  { %s3634_s27 = smov 0   ;;  %s4983_s0 = inlined_call_operand.vmem [shape: bf16[2,8,64], index: 0, kind: input, shape index: {}]   ;;  %s4984_s1 = inlined_call_operand.vmem [shape: bf16[2,16,128], index: 1, kind: input, shape index: {}]   ;;  %s4985_s2 = inlined_call_operand.vmem [shape: f32[1,128], index: 2, kind: input, shape index: {}]   ;;  %s4986_s3 = inlined_call_operand.vmem [shape: bf16[3,64,128], index: 3, kind: input, shape index: {}]   ;;  %s4987_s4 = inlined_call_operand.vmem [shape: bf16[3,256,256], index: 4, kind: input, shape index: {}]   ;;  %s4988_s5 = inlined_call_operand.vmem [shape: f32[1,256], index: 5, kind: input, shape index: {}]   ;;  %s4989_s6 = inlined_call_operand.vmem [shape: bf16[3,256,256], index: 6, kind: input, shape index: {}]   ;;  %s4990_s7 = inlined_call_operand.vmem [shape: f32[1,256], index: 7, kind: input, shape index: {}]   ;;  %s4991_s8 = inlined_call_operand.vmem [shape: f32[2,16,256], index: 8, kind: output, shape index: {}]  }
   0x1 LB: > { %s2372_s28 = sadd.s32 4294967295, %s3586_s27   ;;  %p2376_p0 = scmp.ge.s32.totalorder %s3586_s27, 1  ;;  %s3586_s27 = sphi %s3634_s27, %s18_s27  }
   0x2   : > { %p271_p1 = scmp.lt.s32.totalorder %s3586_s27, 3 }
   0x4   : > { %p272_p2 = pnand %p2376_p0, %p271_p1 }
   0x5   : > { %p309_p3 = scmp.lt.s32.totalorder (!%p272_p2), %s2372_s28, 1 }
   0x6   : > { %275 = sbr.rel (%p272_p2) target bundleno = 712 (0x2c8), region = 52 }
   0xb   : > { %v3365_v0 = vld [vmem:[%s4986_s3 + $0x18] sm:$0xff]  ;;  %v3364_v3 = vld [vmem:[%s4986_s3 + $0x10] sm:$0xff]  ;;  %s4993_s28 = smov (!%p309_p3, %s2372_s28), 1  ;;  %v3363_v6 = vld [vmem:[%s4986_s3 + $0x8] sm:$0xff]  ;;  %vm357_vm0 = vcmask 523264   ;;  %v466_v18 = vlaneseq  ;;  %v3588_v19 = vmov 0.0  }
   0xc   : > { %v3369_v1 = vld [vmem:[%s4986_s3 + $0x38] sm:$0xff]  ;;  %365 = vmatpush.bf16.msra.mxu0 %v3365_v0  ;;  %v3368_v4 = vld [vmem:[%s4986_s3 + $0x30] sm:$0xff]  ;;  %s3360_s19 = sshll.u32 %s4993_s28, 3  ;;  %v3367_v7 = vld [vmem:[%s4986_s3 + $0x28] sm:$0xff]  ;;  %s2377_s9 = sshll.u32 %s4993_s28, 2  ;;  %vm485_vm3 = vcmask 64512  }
   0xd   : > { %v3373_v2 = vld [vmem:[%s4986_s3 + $0x58] sm:$0xff]  ;;  %411 = vmatpush.bf16.msra.mxu1 %v3369_v1  ;;  %v3372_v5 = vld [vmem:[%s4986_s3 + $0x50] sm:$0xff]  ;;  %s317_s22 = scalar_lea.vmem %s4984_s1, %s3360_s19  ;;  %v3371_v9 = vld [vmem:[%s4986_s3 + $0x48] sm:$0xff]  ;;  %s312_s18 = scalar_lea.vmem %s4983_s0, %s2377_s9  ;;  %vm590_vm1 = vcmp.lt.s32.totalorder %v466_v18, 256  ;;  %v470_v20 = vand.u32 127, %v466_v18  ;;  %v3700_v22 = vshrl.u32 %v466_v18, 7 }
   0xe   : > { %457 = vmatpush.bf16.msra.mxu2 %v3373_v2  ;;  %v3567_v8 = vld [vmem:[%s317_s22] sm:$0xff]   ;;  %592 = vst.msk [vmem:[#allocation2] ss:$8 sm:$0x3] %vm590_vm1, %v3588_v19  ;;  %v2616_v24 = vld [vmem:[%s4987_s4 + $0x1f0] sm:$0xf] }
   0xf   : > { %v3568_v10 = vunpack.c.l.bf16 %v3567_v8  ;;  %v3569_v11 = vunpack.c.h.bf16 %v3567_v8  ;;  %v3362_v14 = vld [vmem:[%s4986_s3] sm:$0xff]  ;;  %595 = vst.msk [vmem:[#allocation2 + $0x21] ss:$8 sm:$0x3] %vm590_vm1, %v3588_v19  ;;  %v3698_v21 = vmul.u32 2, %v470_v20  ;;  %v468_v43 = vadd.s32 8, %v3700_v22 }
  0x10   : > { %366 = vmatpush.bf16.msra.mxu0 %v3364_v3  ;;  %v3366_v15 = vld [vmem:[%s4986_s3 + $0x20] sm:$0xff]  ;;  %1450 = vst.msk [vmem:[#allocation3] ss:$8 sm:$0x3] %vm590_vm1, %v3588_v19  ;;  %v3437_v25 = vld [vmem:[%s4987_s4 + $0x1f4] sm:$0xf0] }
  0x11   : > { %412 = vmatpush.bf16.msra.mxu1 %v3368_v4  ;;  %v3676_v12 = vrot.slane %v3568_v10, 7  ;;  %v3678_v13 = vrot.slane %v3569_v11, 7  ;;  %v3370_v16 = vld [vmem:[%s4986_s3 + $0x40] sm:$0xff]  ;;  %1453 = vst.msk [vmem:[#allocation3 + $0x21] ss:$8 sm:$0x3] %vm590_vm1, %v3588_v19  ;;  %v2617_v27 = vor.u32 %v3437_v25, %v2616_v24  ;;  %vm472_vm7 = vcmp.eq.s32.totalorder %v3700_v22, %v3698_v21 }
  0x12   : > { %458 = vmatpush.bf16.msra.mxu2 %v3372_v5  ;;  %v324_v17 = vld [vmem:[%s312_s18] sm:$0xf]  ;;  %v478_v23 = vadd.s32 1, %v3698_v21  ;;  %v3435_v28 = vld [vmem:[%s4987_s4 + $0x1e4] sm:$0xf0]  ;;  %v2457_v38 = vadd.s32 4294967295, %v3698_v21  ;;  %vm473_vm8 = vcmp.eq.s32.totalorder %v468_v43, %v3698_v21 }
  0x13   : > { %619 = vst [vmem:[#allocation2 + $0x8] sm:$0xfe] %v3676_v12  ;;  %v2608_v26 = vld [vmem:[%s4987_s4 + $0x1e0] sm:$0xf]  ;;  %v2552_v29 = vld [vmem:[%s4987_s4 + $0x170] sm:$0xf] }
  0x14   : > { %367 = vmatpush.bf16.msra.mxu0 %v3363_v6  ;;  %623 = vst [vmem:[#allocation2 + $0x28] sm:$0x1] %v3678_v13  ;;  %vm479_vm2 = vcmp.eq.s32.totalorder %v3700_v22, %v478_v23  ;;  %v3421_v30 = vld [vmem:[%s4987_s4 + $0x174] sm:$0xf0]  ;;  %v2609_v32 = vor.u32 %v3435_v28, %v2608_v26  ;;  %v3420_v34 = vld [vmem:[%s4987_s4 + $0x174] sm:$0xf]  ;;  %vm545_vm4 = vcmp.eq.s32.totalorder %v3700_v22, %v2457_v38 }
  0x15   : > { %413 = vmatpush.bf16.msra.mxu1 %v3367_v7  ;;  %v2451_v31 = vsel %vm479_vm2, 1.0, %v3588_v19  ;;  %v2553_v33 = vor.u32 %v3421_v30, %v2552_v29  ;;  %v2600_v35 = vld [vmem:[%s4987_s4 + $0x1d0] sm:$0xf]  ;;  %v3433_v36 = vld [vmem:[%s4987_s4 + $0x1d4] sm:$0xf0]  ;;  %vm480_vm5 = vcmp.eq.s32.totalorder %v468_v43, %v478_v23  ;;  %v2458_v55 = vsel %vm545_vm4, 1.0, %v3588_v19 }
  0x16   : > { %459 = vmatpush.bf16.msra.mxu2 %v3371_v9  ;;  %v2554_v37 = vld [vmem:[%s4987_s4 + $0x178] sm:$0xf0]  ;;  %v2544_v39 = vld [vmem:[%s4987_s4 + $0x160] sm:$0xf]  ;;  %v3419_v40 = vld [vmem:[%s4987_s4 + $0x164] sm:$0xf0]  ;;  %v2601_v46 = vor.u32 %v3433_v36, %v2600_v35  ;;  %vm546_vm6 = vcmp.eq.s32.totalorder %v468_v43, %v2457_v38 }
  0x17   : > { %v2557_v44 = vor.u32 %v3420_v34, %v2554_v37  ;;  %v2545_v45 = vor.u32 %v3419_v40, %v2544_v39  ;;  %v3418_v47 = vld [vmem:[%s4987_s4 + $0x164] sm:$0xf]  ;;  %v2546_v48 = vld [vmem:[%s4987_s4 + $0x168] sm:$0xf0]  ;;  %v2592_v49 = vld [vmem:[%s4987_s4 + $0x1c0] sm:$0xf] }
  0x18   : > { %368 = vmatpush.bf16.msra.mxu0 %v3362_v14  ;;  %v3431_v50 = vld [vmem:[%s4987_s4 + $0x1c4] sm:$0xf0]  ;;  %v3436_v51 = vld [vmem:[%s4987_s4 + $0x1f4] sm:$0xf]  ;;  %v2618_v52 = vld [vmem:[%s4987_s4 + $0x1f8] sm:$0xf0]  ;;  %v2549_v53 = vor.u32 %v3418_v47, %v2546_v48 }
  0x19   : > { %414 = vmatpush.bf16.msra.mxu1 %v3366_v15  ;;  %v2593_v54 = vor.u32 %v3431_v50, %v2592_v49  ;;  %v2621_v56 = vor.u32 %v3436_v51, %v2618_v52  ;;  %v2452_v58 = vsel %vm480_vm5, 1.0, %v3588_v19  ;;  %v3434_v59 = vld [vmem:[%s4987_s4 + $0x1e4] sm:$0xf]  ;;  %v2610_v60 = vld [vmem:[%s4987_s4 + $0x1e8] sm:$0xf0]  ;;  %v2459_v0 = vsel %vm546_vm6, 1.0, %v3588_v19 }
  0x1a   : > { %460 = vmatpush.bf16.msra.mxu2 %v3370_v16  ;;  %v2613_v63 = vor.u32 %v3434_v59, %v2610_v60  ;;  %v2449_v2 = vsel %vm472_vm7, 1.0, %v3588_v19  ;;  %v2450_v3 = vsel %vm473_vm8, 1.0, %v3588_v19  ;;  %v3432_v4 = vld [vmem:[%s4987_s4 + $0x1d4] sm:$0xf]  ;;  %v2602_v5 = vld [vmem:[%s4987_s4 + $0x1d8] sm:$0xf0] }
  0x1b   : > { %2398 = vmatmul.msk.bf16.vlgmr.msra.gmra.mxu0 %vm357_vm0, %v324_v17  ;;  %v2605_v6 = vor.u32 %v3432_v4, %v2602_v5  ;;  %v2536_v7 = vld [vmem:[%s4987_s4 + $0x150] sm:$0xf]  ;;  %v3417_v8 = vld [vmem:[%s4987_s4 + $0x154] sm:$0xf0]  ;;  %v3416_v14 = vld [vmem:[%s4987_s4 + $0x154] sm:$0xf] }
  0x1c   : > { %2423 = vmatmul.msk.bf16.vlgmr.msra.gmra.mxu1 %vm357_vm0, %v324_v17  ;;  %v2584_v9 = vld [vmem:[%s4987_s4 + $0x1b0] sm:$0xf]  ;;  %v2537_v10 = vor.u32 %v3417_v8, %v2536_v7  ;;  %v3429_v11 = vld [vmem:[%s4987_s4 + $0x1b4] sm:$0xf0]  ;;  %v2538_v15 = vld [vmem:[%s4987_s4 + $0x158] sm:$0xf0] }
  0x1d   : > { %2448 = vmatmul.msk.bf16.vlgmr.msra.gmra.mxu2 %vm357_vm0, %v324_v17  ;;  %890 = vmatpush.bf16.msrb.mxu1 %v2553_v33  ;;  %v2585_v16 = vor.u32 %v3429_v11, %v2584_v9  ;;  %v2541_v17 = vor.u32 %v3416_v14, %v2538_v15  ;;  %v3430_v18 = vld [vmem:[%s4987_s4 + $0x1c4] sm:$0xf]  ;;  %v2594_v19 = vld [vmem:[%s4987_s4 + $0x1c8] sm:$0xf0]  ;;  %v2528_v21 = vld [vmem:[%s4987_s4 + $0x140] sm:$0xf] }
  0x1e   : > { %904 = vmatpush.bf16.msrb.mxu2 %v2617_v27  ;;  %v2597_v20 = vor.u32 %v3430_v18, %v2594_v19  ;;  %v3415_v22 = vld [vmem:[%s4987_s4 + $0x144] sm:$0xf0]  ;;  %v2576_v23 = vld [vmem:[%s4987_s4 + $0x1a0] sm:$0xf]  ;;  %v3414_v26 = vld [vmem:[%s4987_s4 + $0x144] sm:$0xf] }
  0x1f   : > { %v2529_v24 = vor.u32 %v3415_v22, %v2528_v21  ;;  %v3427_v25 = vld [vmem:[%s4987_s4 + $0x1a4] sm:$0xf0]  ;;  %v2530_v27 = vld [vmem:[%s4987_s4 + $0x148] sm:$0xf0]  ;;  %v3428_v30 = vld [vmem:[%s4987_s4 + $0x1b4] sm:$0xf] }
  0x20   : > { %v2577_v28 = vor.u32 %v3427_v25, %v2576_v23  ;;  %v2533_v29 = vor.u32 %v3414_v26, %v2530_v27  ;;  %v2520_v33 = vld [vmem:[%s4987_s4 + $0x130] sm:$0xf]  ;;  %v3413_v34 = vld [vmem:[%s4987_s4 + $0x134] sm:$0xf0]  ;;  %v3412_v38 = vld [vmem:[%s4987_s4 + $0x134] sm:$0xf] }
  0x21   : > { %891 = vmatpush.bf16.msrb.mxu1 %v2545_v45  ;;  %v2568_v35 = vld [vmem:[%s4987_s4 + $0x190] sm:$0xf]  ;;  %v2521_v36 = vor.u32 %v3413_v34, %v2520_v33  ;;  %v3425_v37 = vld [vmem:[%s4987_s4 + $0x194] sm:$0xf0]  ;;  %v2522_v39 = vld [vmem:[%s4987_s4 + $0x138] sm:$0xf0] }
  0x22   : > { %905 = vmatpush.bf16.msrb.mxu2 %v2609_v32  ;;  %v2569_v40 = vor.u32 %v3425_v37, %v2568_v35  ;;  %v2578_v43 = vld [vmem:[%s4987_s4 + $0x1a8] sm:$0xf0]  ;;  %v2512_v45 = vld [vmem:[%s4987_s4 + $0x120] sm:$0xf]  ;;  %v3423_v49 = vld [vmem:[%s4987_s4 + $0x184] sm:$0xf0] }
  0x23   : > { %v2560_v47 = vld [vmem:[%s4987_s4 + $0x180] sm:$0xf]  ;;  %v3410_v50 = vld [vmem:[%s4987_s4 + $0x124] sm:$0xf]  ;;  %v2514_v51 = vld [vmem:[%s4987_s4 + $0x128] sm:$0xf0] }
  0x24   : > { %v2561_v52 = vor.u32 %v3423_v49, %v2560_v47  ;;  %v2504_v60 = vld [vmem:[%s4987_s4 + $0x110] sm:$0xf]  ;;  %v3422_v5 = vld [vmem:[%s4987_s4 + $0x184] sm:$0xf]  ;;  %v3404_v8 = vld [vmem:[%s4987_s4 + $0xf4] sm:$0xf] }
  0x25   : > { %892 = vmatpush.bf16.msrb.mxu1 %v2537_v10  ;;  %v2746_v9 = vld [vmem:[%s4987_s4 + $0xf8] sm:$0xf0]  ;;  %v2496_v11 = vld [vmem:[%s4987_s4 + $0x100] sm:$0xf]  ;;  %v3407_v14 = vld [vmem:[%s4987_s4 + $0x104] sm:$0xf0] }
  0x26   : > { %906 = vmatpush.bf16.msrb.mxu2 %v2601_v46  ;;  %v3411_v46 = vld [vmem:[%s4987_s4 + $0x124] sm:$0xf0]  ;;  %v2749_v10 = vor.u32 %v3404_v8, %v2746_v9  ;;  %v3406_v15 = vld [vmem:[%s4987_s4 + $0x104] sm:$0xf]  ;;  %v2680_v18 = vld [vmem:[%s4987_s4 + $0x70] sm:$0xf] }
  0x27   : > { %v2513_v48 = vor.u32 %v3411_v46, %v2512_v45  ;;  %v3389_v19 = vld [vmem:[%s4987_s4 + $0x74] sm:$0xf0]  ;;  %v2728_v22 = vld [vmem:[%s4987_s4 + $0xd0] sm:$0xf]  ;;  %v2682_v26 = vld [vmem:[%s4987_s4 + $0x78] sm:$0xf0] }
  0x28   : > { %v2681_v21 = vor.u32 %v3389_v19, %v2680_v18  ;;  %v3401_v23 = vld [vmem:[%s4987_s4 + $0xd4] sm:$0xf0]  ;;  %v3402_v27 = vld [vmem:[%s4987_s4 + $0xe4] sm:$0xf]  ;;  %v2720_v33 = vld [vmem:[%s4987_s4 + $0xc0] sm:$0xf] }
  0x29   : > { %893 = vmatpush.bf16.msrb.mxu1 %v2529_v24  ;;  %v3388_v24 = vld [vmem:[%s4987_s4 + $0x74] sm:$0xf]  ;;  %v2729_v25 = vor.u32 %v3401_v23, %v2728_v22  ;;  %v3399_v35 = vld [vmem:[%s4987_s4 + $0xc4] sm:$0xf0]  ;;  %v2674_v37 = vld [vmem:[%s4987_s4 + $0x68] sm:$0xf0] }
  0x2a   : > { %907 = vmatpush.bf16.msrb.mxu2 %v2593_v54  ;;  %v2744_v54 = vld [vmem:[%s4987_s4 + $0xf0] sm:$0xf]  ;;  %v3397_v47 = vld [vmem:[%s4987_s4 + $0xb4] sm:$0xf0]  ;;  %v2666_v49 = vld [vmem:[%s4987_s4 + $0x58] sm:$0xf0] }
  0x2b   : > { %v2712_v45 = vld [vmem:[%s4987_s4 + $0xb0] sm:$0xf]  ;;  %vm605_vm9 = vcmask 1040384   ;;  %v3394_v18 = vld [vmem:[%s4987_s4 + $0xa4] sm:$0xf]  ;;  %vm1207_vm11 = vcmask 1046528  }
  0x2c   : > { %v2706_v19 = vld [vmem:[%s4987_s4 + $0xa8] sm:$0xf0]  ;;  %vm703_vm10 = vsmask.f32 7424  ;;  %s3361_s13 = sshll.u32 %s4993_s28, 5 }
  0x2d   : > { %894 = vmatpush.bf16.msrb.mxu1 %v2521_v36  ;;  %v3386_v36 = vld [vmem:[%s4987_s4 + $0x64] sm:$0xf]  ;;  %s322_s16 = scalar_lea.vmem %s4991_s8, %s3361_s13 }
  0x2e   : > { %908 = vmatpush.bf16.msrb.mxu2 %v2585_v16  ;;  %v2497_v16 = vor.u32 %v3407_v14, %v2496_v11  ;;  %v3393_v11 = vld [vmem:[%s4987_s4 + $0x94] sm:$0xf0]  ;;  %v3380_v14 = vld [vmem:[%s4987_s4 + $0x34] sm:$0xf] }
  0x31   : > { %895 = vmatpush.bf16.msrb.mxu1 %v2513_v48  ;;  %v3384_v48 = vld [vmem:[%s4987_s4 + $0x54] sm:$0xf] }
  0x32   : > { %909 = vmatpush.bf16.msrb.mxu2 %v2577_v28  ;;  %v2685_v28 = vor.u32 %v3388_v24, %v2682_v26  ;;  %v2640_v24 = vld [vmem:[%s4987_s4 + $0x20] sm:$0xf] }
  0x33   : > { %v2688_v26 = vld [vmem:[%s4987_s4 + $0x80] sm:$0xf] }
  0x36   : > { %910 = vmatpush.bf16.msrb.mxu2 %v2569_v40  ;;  %v3400_v40 = vld [vmem:[%s4987_s4 + $0xd4] sm:$0xf] }
  0x3a   : > { %911 = vmatpush.bf16.msrb.mxu2 %v2561_v52  ;;  %v3398_v52 = vld [vmem:[%s4987_s4 + $0xc4] sm:$0xf] }
  0x98   : > { %v370_v41 = vpop.f32.mrf.mxu0 }
  0x99   : > { %v416_v42 = vpop.f32.mrf.mxu1 }
  0x9a   : > { %507 = vmatpush.msra.mxu3 %v416_v42  ;;  %v3426_v42 = vld [vmem:[%s4987_s4 + $0x1a4] sm:$0xf] }
  0x9b   : > { %2453 = vmatmul.msk.f32.vlgmr.msra.gmra.mxu3 %vm485_vm3, %v2451_v31  ;;  %v2586_v31 = vld [vmem:[%s4987_s4 + $0x1b8] sm:$0xf0] }
  0x9c   : > { %536 = vmatpush.msrb.mxu3 %v370_v41  ;;  %v2589_v32 = vor.u32 %v3428_v30, %v2586_v31  ;;  %v2525_v41 = vor.u32 %v3412_v38, %v2522_v39  ;;  %v2672_v31 = vld [vmem:[%s4987_s4 + $0x60] sm:$0xf]  ;;  %v2721_v38 = vor.u32 %v3399_v35, %v2720_v33  ;;  %v2677_v39 = vor.u32 %v3386_v36, %v2674_v37  ;;  %v2642_v33 = vld [vmem:[%s4987_s4 + $0x28] sm:$0xf0]  ;;  %v2904_v35 = vld [vmem:[%s4987_s4 + $0x2f0] sm:$0xf] }
  0x9d   : > { %v3469_v36 = vld [vmem:[%s4987_s4 + $0x2f4] sm:$0xf0]  ;;  %v3392_v37 = vld [vmem:[%s4987_s4 + $0x94] sm:$0xf] }
  0x9e   : > { %918 = vmatpush.bf16.msra.mxu3 %v2557_v44  ;;  %v2581_v44 = vor.u32 %v3426_v42, %v2578_v43  ;;  %v2664_v43 = vld [vmem:[%s4987_s4 + $0x50] sm:$0xf] }
  0xa0   : > { %v462_v57 = vpop.f32.mrf.mxu2  ;;  %v372_v61 = vpop.f32.mrf.mxu0 }
  0xa1   : > { %v418_v62 = vpop.f32.mrf.mxu1  ;;  %572 = vmatpush.msrb.mxu0 %v462_v57  ;;  %v3409_v61 = vld [vmem:[%s4987_s4 + $0x114] sm:$0xf0] }
  0xa2   : > { %919 = vmatpush.bf16.msra.mxu3 %v2549_v53  ;;  %2460 = vmatmul.msk.f32.vlgmr.msrb.gmra.mxu0 %vm485_vm3, %v2458_v55  ;;  %v2517_v53 = vor.u32 %v3410_v50, %v2514_v51  ;;  %v3405_v55 = vld [vmem:[%s4987_s4 + $0xf4] sm:$0xf0]  ;;  %v3408_v62 = vld [vmem:[%s4987_s4 + $0x114] sm:$0xf]  ;;  %v2713_v50 = vor.u32 %v3397_v47, %v2712_v45  ;;  %v2669_v51 = vor.u32 %v3384_v48, %v2666_v49  ;;  %v2634_v47 = vld [vmem:[%s4987_s4 + $0x18] sm:$0xf0] }
  0xa3   : > { %2454 = vmatmul.msk.f32.gmra.mxu3 %vm485_vm3, %v2452_v58  ;;  %932 = vmatpush.bf16.msra.mxu0 %v2621_v56  ;;  %v3424_v56 = vld [vmem:[%s4987_s4 + $0x194] sm:$0xf]  ;;  %v2745_v57 = vor.u32 %v3405_v55, %v2744_v54  ;;  %v2570_v58 = vld [vmem:[%s4987_s4 + $0x198] sm:$0xf0]  ;;  %v2656_v55 = vld [vmem:[%s4987_s4 + $0x40] sm:$0xf] }
  0xa4   : > { %v2573_v59 = vor.u32 %v3424_v56, %v2570_v58  ;;  %v3383_v56 = vld [vmem:[%s4987_s4 + $0x44] sm:$0xf0]  ;;  %v2896_v48 = vld [vmem:[%s4987_s4 + $0x2e0] sm:$0xf] }
  0xa5   : > { %1120 = vmatpush.bf16.msra.mxu2 %v2745_v57  ;;  %v4013_v57 = vsel %vm605_vm9, %v3676_v12, %v3678_v13  ;;  %v2657_v58 = vor.u32 %v3383_v56, %v2656_v55  ;;  %v2658_v12 = vld [vmem:[%s4987_s4 + $0x48] sm:$0xf0]  ;;  %v3396_v13 = vld [vmem:[%s4987_s4 + $0xb4] sm:$0xf]  ;;  %v2906_v56 = vld [vmem:[%s4987_s4 + $0x2f8] sm:$0xf0] }
  0xa6   : > { %920 = vmatpush.bf16.msra.mxu3 %v2541_v17  ;;  %v2498_v17 = vld [vmem:[%s4987_s4 + $0x108] sm:$0xf0]  ;;  %v3468_v55 = vld [vmem:[%s4987_s4 + $0x2f4] sm:$0xf] }
  0xa7   : > { %933 = vmatpush.bf16.msra.mxu0 %v2613_v63  ;;  %v2505_v63 = vor.u32 %v3409_v61, %v2504_v60  ;;  %v3395_v60 = vld [vmem:[%s4987_s4 + $0xa4] sm:$0xf0]  ;;  %v3382_v61 = vld [vmem:[%s4987_s4 + $0x44] sm:$0xf] }
  0xa8   : > { %v464_v1 = vpop.f32.mrf.mxu2 }
  0xa9   : > { %v2736_v1 = vld [vmem:[%s4987_s4 + $0xe0] sm:$0xf]  ;;  %896 = vmatpush.bf16.msrb.mxu1 %v2505_v63 }
  0xaa   : > { %2461 = vmatmul.msk.f32.gmra.mxu0 %vm485_vm3, %v2459_v0  ;;  %921 = vmatpush.bf16.msra.mxu3 %v2533_v29  ;;  %v2506_v0 = vld [vmem:[%s4987_s4 + $0x118] sm:$0xf0]  ;;  %v2738_v29 = vld [vmem:[%s4987_s4 + $0xe8] sm:$0xf0] }
  0xab   : > { %2455 = vmatmul.msk.f32.vlgmr.msrb.gmra.mxu3 %vm485_vm3, %v2449_v2  ;;  %934 = vmatpush.bf16.msra.mxu0 %v2605_v6  ;;  %v3403_v2 = vld [vmem:[%s4987_s4 + $0xe4] sm:$0xf0]  ;;  %v2562_v6 = vld [vmem:[%s4987_s4 + $0x188] sm:$0xf0]  ;;  %v2741_v30 = vor.u32 %v3402_v27, %v2738_v29 }
  0xac   : > { %v2737_v4 = vor.u32 %v3403_v2, %v2736_v1  ;;  %v2565_v7 = vor.u32 %v3422_v5, %v2562_v6  ;;  %v2714_v1 = vld [vmem:[%s4987_s4 + $0xb8] sm:$0xf0]  ;;  %v663_v2 = vld [vmem:[#allocation2 + $0x8] sm:$0xfe]  ;;  %v2648_v5 = vld [vmem:[%s4987_s4 + $0x30] sm:$0xf] }
  0xad   : > { %897 = vmatpush.bf16.msrb.mxu1 %v2497_v16  ;;  %v3381_v6 = vld [vmem:[%s4987_s4 + $0x34] sm:$0xf0]  ;;  %v667_v8 = vpack.c.bf16 %v4013_v57, %v663_v2  ;;  %v3391_v27 = vld [vmem:[%s4987_s4 + $0x84] sm:$0xf0]  ;;  %v2888_v2 = vld [vmem:[%s4987_s4 + $0x2d0] sm:$0xf] }
  0xae   : > { %922 = vmatpush.bf16.msra.mxu3 %v2525_v41  ;;  %1121 = vmatpush.bf16.msra.mxu2 %v2737_v4  ;;  %v2730_v41 = vld [vmem:[%s4987_s4 + $0xd8] sm:$0xf0]  ;;  %v2717_v4 = vor.u32 %v3396_v13, %v2714_v1 }
  0xaf   : > { %935 = vmatpush.bf16.msra.mxu0 %v2597_v20  ;;  %v2501_v20 = vor.u32 %v3406_v15, %v2498_v17  ;;  %v2733_v42 = vor.u32 %v3400_v40, %v2730_v41  ;;  %v2650_v15 = vld [vmem:[%s4987_s4 + $0x38] sm:$0xf0]  ;;  %v719_v22 = vshll.u32 %v667_v8, 16  ;;  %v2905_v40 = vor.u32 %v3469_v36, %v2904_v35  ;;  %v3460_v36 = vld [vmem:[%s4987_s4 + $0x2b4] sm:$0xf] }
  0xb0   : > { %v2653_v17 = vor.u32 %v3380_v14, %v2650_v15  ;;  %v2698_v41 = vld [vmem:[%s4987_s4 + $0x98] sm:$0xf0]  ;;  %v3463_v14 = vld [vmem:[%s4987_s4 + $0x2c4] sm:$0xf0] }
  0xb1   : > { %1106 = vmatpush.bf16.msra.mxu1 %v2681_v21  ;;  %v717_v21 = vshrl.u32 %v667_v8, 16 }
  0xb2   : > { %923 = vmatpush.bf16.msra.mxu3 %v2517_v53  ;;  %1122 = vmatpush.bf16.msra.mxu2 %v2729_v25  ;;  %v2722_v53 = vld [vmem:[%s4987_s4 + $0xc8] sm:$0xf0]  ;;  %v3379_v25 = vld [vmem:[%s4987_s4 + $0x24] sm:$0xf0] }
  0xb3   : > { %2456 = vmatmul.msk.f32.gmra.mxu3 %vm485_vm3, %v2450_v3  ;;  %936 = vmatpush.bf16.msra.mxu0 %v2589_v32  ;;  %v2509_v3 = vor.u32 %v3408_v62, %v2506_v0  ;;  %v3387_v32 = vld [vmem:[%s4987_s4 + $0x64] sm:$0xf0]  ;;  %v2725_v54 = vor.u32 %v3398_v52, %v2722_v53  ;;  %v2661_v0 = vor.u32 %v3382_v61, %v2658_v12  ;;  %v3390_v52 = vld [vmem:[%s4987_s4 + $0x84] sm:$0xf]  ;;  %v2690_v53 = vld [vmem:[%s4987_s4 + $0x88] sm:$0xf0] }
  0xb4   : > { %v2673_v34 = vor.u32 %v3387_v32, %v2672_v31  ;;  %v2689_v31 = vor.u32 %v3391_v27, %v2688_v26  ;;  %v3378_v32 = vld [vmem:[%s4987_s4 + $0x24] sm:$0xf]  ;;  %v3375_v61 = vld [vmem:[%s4987_s4 + $0x4] sm:$0xf0] }
  0xb6   : > { %924 = vmatpush.bf16.msra.mxu3 %v2509_v3  ;;  %1107 = vmatpush.bf16.msra.mxu1 %v2673_v34  ;;  %v665_v3 = vld [vmem:[#allocation2 + $0x28] sm:$0x1]  ;;  %v2645_v34 = vor.u32 %v3378_v32, %v2642_v33  ;;  %v2864_v32 = vld [vmem:[%s4987_s4 + $0x2a0] sm:$0xf] }
  0xb7   : > { %937 = vmatpush.bf16.msra.mxu0 %v2581_v44  ;;  %1123 = vmatpush.bf16.msra.mxu2 %v2721_v38  ;;  %v3385_v44 = vld [vmem:[%s4987_s4 + $0x54] sm:$0xf0]  ;;  %v669_v9 = vpack.c.bf16 %v665_v3, %v665_v3  ;;  %v3459_v33 = vld [vmem:[%s4987_s4 + $0x2a4] sm:$0xf0] }
  0xb8   : > { %v2665_v46 = vor.u32 %v3385_v44, %v2664_v43  ;;  %v3377_v43 = vld [vmem:[%s4987_s4 + $0x14] sm:$0xf0]  ;;  %v2701_v44 = vor.u32 %v3392_v37, %v2698_v41  ;;  %v2865_v35 = vor.u32 %v3459_v33, %v2864_v32  ;;  %v2874_v37 = vld [vmem:[%s4987_s4 + $0x2b8] sm:$0xf0]  ;;  %v2818_v32 = vld [vmem:[%s4987_s4 + $0x248] sm:$0xf0] }
  0xb9   : > { %v724_v23 = vshll.u32 %v669_v9, 16  ;;  %v3465_v3 = vld [vmem:[%s4987_s4 + $0x2d4] sm:$0xf0]  ;;  %v3579_v9 = vld [vmem:[%s4985_s2] ss:$0 sm:$0xff] }
  0xba   : > { %925 = vmatpush.bf16.msra.mxu3 %v2501_v20  ;;  %1108 = vmatpush.bf16.msra.mxu1 %v2665_v46  ;;  %v2709_v20 = vor.u32 %v3394_v18, %v2706_v19  ;;  %v3376_v46 = vld [vmem:[%s4987_s4 + $0x14] sm:$0xf] }
  0xbb   : > { %938 = vmatpush.bf16.msra.mxu0 %v2573_v59  ;;  %1124 = vmatpush.bf16.msra.mxu2 %v2713_v50  ;;  %v2704_v59 = vld [vmem:[%s4987_s4 + $0xa0] sm:$0xf]  ;;  %v726_v29 = vrot.slane %v724_v23, 1  ;;  %v2637_v50 = vor.u32 %v3376_v46, %v2634_v47  ;;  %v3458_v46 = vld [vmem:[%s4987_s4 + $0x2a4] sm:$0xf] }
  0xbc   : > { %v2705_v62 = vor.u32 %v3395_v60, %v2704_v59  ;;  %v2909_v59 = vor.u32 %v3468_v55, %v2906_v56  ;;  %v2624_v60 = vld [vmem:[%s4987_s4] sm:$0xf]  ;;  %v2866_v47 = vld [vmem:[%s4987_s4 + $0x2a8] sm:$0xf0]  ;;  %v2858_v55 = vld [vmem:[%s4987_s4 + $0x298] sm:$0xf0] }
  0xbd   : > { %v2625_v13 = vor.u32 %v3375_v61, %v2624_v60  ;;  %v1163_v56 = vld [vmem:[#allocation2 + $0x8] sm:$0xfc] }
  0xbe   : > { %1134 = vmatpush.bf16.msrb.mxu3 %v2685_v28  ;;  %1109 = vmatpush.bf16.msra.mxu1 %v2657_v58  ;;  %v721_v28 = vrot.slane %v719_v22, 1  ;;  %v3461_v22 = vld [vmem:[%s4987_s4 + $0x2b4] sm:$0xf0]  ;;  %v1167_v60 = vpack.c.bf16 %v4013_v57, %v1163_v56 }
  0xbf   : > { %939 = vmatpush.bf16.msra.mxu0 %v2565_v7  ;;  %1125 = vmatpush.bf16.msra.mxu2 %v2705_v62  ;;  %v2696_v7 = vld [vmem:[%s4987_s4 + $0x90] sm:$0xf]  ;;  %v3374_v62 = vld [vmem:[%s4987_s4 + $0x4] sm:$0xf] }
  0xc0   : > { %v2697_v16 = vor.u32 %v3393_v11, %v2696_v7  ;;  %v2898_v7 = vld [vmem:[%s4987_s4 + $0x2e8] sm:$0xf0]  ;;  %v2880_v11 = vld [vmem:[%s4987_s4 + $0x2c0] sm:$0xf] }
  0xc2   : > { %1135 = vmatpush.bf16.msrb.mxu3 %v2677_v39  ;;  %v722_v39 = vor.u32 %v721_v28, %v717_v21  ;;  %v2872_v21 = vld [vmem:[%s4987_s4 + $0x2b0] sm:$0xf]  ;;  %v3462_v28 = vld [vmem:[%s4987_s4 + $0x2c4] sm:$0xf] }
  0xc3   : > { %1148 = vmatpush.bf16.msrb.mxu0 %v2749_v10  ;;  %v2649_v10 = vor.u32 %v3381_v6, %v2648_v5  ;;  %1126 = vmatpush.bf16.msra.mxu2 %v2697_v16  ;;  %v2889_v5 = vor.u32 %v3465_v3, %v2888_v2  ;;  %v3466_v6 = vld [vmem:[%s4987_s4 + $0x2e4] sm:$0xf]  ;;  %v2881_v16 = vor.u32 %v3463_v14, %v2880_v11  ;;  %v2840_v3 = vld [vmem:[%s4987_s4 + $0x270] sm:$0xf] }
  0xc4   : > { %v727_v49 = vsel %vm703_vm10, %v722_v39, %v726_v29  ;;  %v2873_v27 = vor.u32 %v3461_v22, %v2872_v21  ;;  %v2882_v29 = vld [vmem:[%s4987_s4 + $0x2c8] sm:$0xf0]  ;;  %v2877_v39 = vor.u32 %v3460_v36, %v2874_v37  ;;  %v3445_v36 = vld [vmem:[%s4987_s4 + $0x234] sm:$0xf0]  ;;  %v3444_v37 = vld [vmem:[%s4987_s4 + $0x234] sm:$0xf] }
  0xc5   : > { %1110 = vmatpush.bf16.msra.mxu1 %v2649_v10  ;;  %912 = vmatmul.bf16.vlgmr.msrb.gmra.mxu2 %v727_v49  ;;  %v2901_v10 = vor.u32 %v3466_v6, %v2898_v7  ;;  %v2842_v6 = vld [vmem:[%s4987_s4 + $0x278] sm:$0xf0] }
  0xc6   : > { %1136 = vmatpush.bf16.msrb.mxu3 %v2669_v51  ;;  %v3467_v51 = vld [vmem:[%s4987_s4 + $0x2e4] sm:$0xf0]  ;;  %940 = vmatmul.bf16.vlgmr.msra.gmra.mxu0 %v727_v49  ;;  %v2869_v49 = vor.u32 %v3458_v46, %v2866_v47  ;;  %v3442_v46 = vld [vmem:[%s4987_s4 + $0x224] sm:$0xf]  ;;  %v2802_v47 = vld [vmem:[%s4987_s4 + $0x228] sm:$0xf0] }
  0xc7   : > { %1149 = vmatpush.bf16.msrb.mxu0 %v2741_v30  ;;  %v2641_v30 = vor.u32 %v3379_v25, %v2640_v24  ;;  %1127 = vmatpush.bf16.msra.mxu2 %v2689_v31  ;;  %v2897_v58 = vor.u32 %v3467_v51, %v2896_v48  ;;  %v2885_v31 = vor.u32 %v3462_v28, %v2882_v29  ;;  %v3455_v51 = vld [vmem:[%s4987_s4 + $0x284] sm:$0xf0]  ;;  %v2816_v29 = vld [vmem:[%s4987_s4 + $0x240] sm:$0xf] }
  0xc9   : > { %1111 = vmatpush.bf16.msra.mxu1 %v2641_v30 }
  0xca   : > { %1137 = vmatpush.bf16.msrb.mxu3 %v2661_v0  ;;  %v2626_v0 = vld [vmem:[%s4987_s4 + $0x8] sm:$0xf0] }
  0xcb   : > { %1150 = vmatpush.bf16.msrb.mxu0 %v2733_v42  ;;  %v2632_v42 = vld [vmem:[%s4987_s4 + $0x10] sm:$0xf]  ;;  %1390 = vmatpush.bf16.msrb.mxu2 %v2905_v40  ;;  %v2629_v1 = vor.u32 %v3374_v62, %v2626_v0  ;;  %v3454_v0 = vld [vmem:[%s4987_s4 + $0x284] sm:$0xf] }
  0xcc   : > { %v2633_v45 = vor.u32 %v3377_v43, %v2632_v42  ;;  %v2856_v40 = vld [vmem:[%s4987_s4 + $0x290] sm:$0xf]  ;;  %v3457_v42 = vld [vmem:[%s4987_s4 + $0x294] sm:$0xf0] }
  0xce   : > { %1138 = vmatpush.bf16.msrb.mxu3 %v2653_v17  ;;  %1112 = vmatpush.bf16.msra.mxu1 %v2633_v45  ;;  %v2890_v17 = vld [vmem:[%s4987_s4 + $0x2d8] sm:$0xf0] }
  0xcf   : > { %1151 = vmatpush.bf16.msrb.mxu0 %v2725_v54  ;;  %v2693_v54 = vor.u32 %v3390_v52, %v2690_v53  ;;  %1391 = vmatpush.bf16.msrb.mxu2 %v2897_v58  ;;  %v1165_v58 = vld [vmem:[#allocation2 + $0x28] sm:$0x3] }
  0xd0   : > { %v1169_v61 = vpack.c.bf16 %v1165_v58, %v1165_v58  ;;  %v2784_v58 = vld [vmem:[%s4987_s4 + $0x200] sm:$0xf] }
  0xd2   : > { %1139 = vmatpush.bf16.msrb.mxu3 %v2645_v34  ;;  %1113 = vmatpush.bf16.msra.mxu1 %v2625_v13  ;;  %v1212_v13 = vrot.slane %v1169_v61, 1  ;;  %v3438_v61 = vld [vmem:[%s4987_s4 + $0x204] sm:$0xf] }
  0xd3   : > { %1152 = vmatpush.bf16.msrb.mxu0 %v2717_v4  ;;  %1392 = vmatpush.bf16.msrb.mxu2 %v2889_v5  ;;  %v3452_v5 = vld [vmem:[%s4987_s4 + $0x274] sm:$0xf] }
  0xd6   : > { %1140 = vmatpush.bf16.msrb.mxu3 %v2637_v50  ;;  %v2848_v50 = vld [vmem:[%s4987_s4 + $0x280] sm:$0xf] }
  0xd7   : > { %1153 = vmatpush.bf16.msrb.mxu0 %v2709_v20  ;;  %v625_v20 = vld [vmem:[#allocation2 + $0x8] sm:$0xff]  ;;  %1393 = vmatpush.bf16.msrb.mxu2 %v2881_v16  ;;  %v2849_v53 = vor.u32 %v3455_v51, %v2848_v50  ;;  %v2845_v16 = vor.u32 %v3452_v5, %v2842_v6  ;;  %v2792_v50 = vld [vmem:[%s4987_s4 + $0x210] sm:$0xf]  ;;  %v3441_v51 = vld [vmem:[%s4987_s4 + $0x214] sm:$0xf0] }
  0xd8   : > { %v629_v24 = vpack.c.bf16 %v4013_v57, %v625_v20  ;;  %v2850_v57 = vld [vmem:[%s4987_s4 + $0x288] sm:$0xf0]  ;;  %v3517_v5 = vld [vmem:[%s4989_s6 + $0x174] sm:$0xf0] }
  0xda   : > { %1141 = vmatpush.bf16.msrb.mxu3 %v2629_v1  ;;  %1128 = vmatmul.bf16.vlgmr.msra.gmra.mxu2 %v629_v24 }
  0xdb   : > { %1154 = vmatpush.bf16.msrb.mxu0 %v2701_v44  ;;  %1394 = vmatpush.bf16.msrb.mxu2 %v2873_v27  ;;  %v2857_v44 = vor.u32 %v3457_v42, %v2856_v40  ;;  %v2800_v42 = vld [vmem:[%s4987_s4 + $0x220] sm:$0xf] }
  0xdf   : > { %1155 = vmatpush.bf16.msrb.mxu0 %v2693_v54  ;;  %1395 = vmatpush.bf16.msrb.mxu2 %v2865_v35  ;;  %v3456_v54 = vld [vmem:[%s4987_s4 + $0x294] sm:$0xf]  ;;  %v2808_v35 = vld [vmem:[%s4987_s4 + $0x230] sm:$0xf] }
  0xe0   : > { %v2809_v40 = vor.u32 %v3445_v36, %v2808_v35  ;;  %v2976_v35 = vld [vmem:[%s4989_s6 + $0x140] sm:$0xf]  ;;  %v3511_v36 = vld [vmem:[%s4989_s6 + $0x144] sm:$0xf0] }
  0xe2   : > { %1156 = vmatmul.bf16.vlgmr.msrb.gmra.mxu0 %v629_v24  ;;  %v3449_v24 = vld [vmem:[%s4987_s4 + $0x254] sm:$0xf0] }
  0xe3   : > { %1418 = vmatpush.bf16.msra.mxu0 %v2909_v59  ;;  %1396 = vmatpush.bf16.msrb.mxu2 %v2857_v44  ;;  %v2861_v59 = vor.u32 %v3456_v54, %v2858_v55  ;;  %v3443_v44 = vld [vmem:[%s4987_s4 + $0x224] sm:$0xf0]  ;;  %v2793_v55 = vor.u32 %v3441_v51, %v2792_v50 }
  0xe7   : > { %1419 = vmatpush.bf16.msra.mxu0 %v2901_v10  ;;  %1397 = vmatpush.bf16.msrb.mxu2 %v2849_v53  ;;  %v2794_v53 = vld [vmem:[%s4987_s4 + $0x218] sm:$0xf0] }
 0x11e   : > { %v4030_v63 = vpop.f32.mrf.mxu3 }
 0x11f   : > { %v574_v12 = vpop.f32.mrf.mxu0 }
 0x126   : > { %v4087_v38 = vpop.f32.mrf.mxu3 }
 0x127   : > { %v577_v26 = vpop.f32.mrf.mxu0 }
 0x12e   : > { %v538_v4 = vpop.f32.mrf.mxu3 }
 0x12f   : > { %v539_v8 = vadd.f32 %v538_v4, %v4030_v63  ;;  %v3464_v63 = vld [vmem:[%s4987_s4 + $0x2d4] sm:$0xf]  ;;  %v3453_v4 = vld [vmem:[%s4987_s4 + $0x274] sm:$0xf0] }
 0x130   : > { %v2893_v19 = vor.u32 %v3464_v63, %v2890_v17  ;;  %v2832_v63 = vld [vmem:[%s4987_s4 + $0x260] sm:$0xf]  ;;  %v3451_v17 = vld [vmem:[%s4987_s4 + $0x264] sm:$0xf0] }
 0x131   : > { %v580_v15 = vadd.f32 %v574_v12, %v539_v8  ;;  %v1211_v12 = vrot.slane %v1167_v60, 1  ;;  %v2853_v8 = vor.u32 %v3454_v0, %v2850_v57  ;;  %v2833_v21 = vor.u32 %v3451_v17, %v2832_v63  ;;  %v3439_v60 = vld [vmem:[%s4987_s4 + $0x204] sm:$0xf0]  ;;  %v3064_v63 = vld [vmem:[%s4989_s6 + $0x1f0] sm:$0xf] }
 0x132   : > { %1420 = vmatpush.bf16.msra.mxu0 %v2893_v19  ;;  %v2834_v19 = vld [vmem:[%s4987_s4 + $0x268] sm:$0xf0]  ;;  %v3533_v17 = vld [vmem:[%s4989_s6 + $0x1f4] sm:$0xf0] }
 0x133   : > { %v586_v18 = vadd.f32 %v3579_v9, %v580_v15  ;;  %v1213_v7 = vsel %vm1207_vm11, %v1211_v12, %v1212_v13  ;;  %v2841_v15 = vor.u32 %v3453_v4, %v2840_v3  ;;  %v2785_v13 = vor.u32 %v3439_v60, %v2784_v58  ;;  %v3000_v4 = vld [vmem:[%s4989_s6 + $0x170] sm:$0xf]  ;;  %v3526_v58 = vld [vmem:[%s4989_s6 + $0x1c4] sm:$0xf] }
 0x134   : > { %1398 = vmatmul.bf16.vlgmr.msrb.gmra.mxu2 %v1213_v7  ;;  %v3001_v6 = vor.u32 %v3517_v5, %v3000_v4  ;;  %v3032_v4 = vld [vmem:[%s4989_s6 + $0x1b0] sm:$0xf]  ;;  %v3525_v5 = vld [vmem:[%s4989_s6 + $0x1b4] sm:$0xf0] }
 0x135   : > { %v606_v23 = vrot.slane %v586_v18, 7  ;;  %v3450_v18 = vld [vmem:[%s4987_s4 + $0x264] sm:$0xf] }
 0x136   : > { %v541_v25 = vpop.f32.mrf.mxu3  ;;  %1421 = vmatpush.bf16.msra.mxu0 %v2885_v31  ;;  %v2837_v22 = vor.u32 %v3450_v18, %v2834_v19  ;;  %v3446_v31 = vld [vmem:[%s4987_s4 + $0x244] sm:$0xf]  ;;  %v3532_v18 = vld [vmem:[%s4989_s6 + $0x1f4] sm:$0xf]  ;;  %v3065_v19 = vor.u32 %v3533_v17, %v3064_v63  ;;  %v2954_v63 = vld [vmem:[%s4989_s6 + $0x118] sm:$0xf0] }
 0x137   : > { %618 = vst [vmem:[#allocation2] sm:$0xfe] %v606_v23  ;;  %v542_v30 = vadd.f32 %v541_v25, %v4087_v38  ;;  %v3448_v25 = vld [vmem:[%s4987_s4 + $0x254] sm:$0xf] }
 0x138   : > { %1756 = vmatpush.bf16.msra.mxu2 %v3065_v19  ;;  %v3523_v19 = vld [vmem:[%s4989_s6 + $0x1a4] sm:$0xf0] }
 0x139   : > { %v581_v34 = vadd.f32 %v577_v26, %v542_v30  ;;  %v2826_v26 = vld [vmem:[%s4987_s4 + $0x258] sm:$0xf0]  ;;  %v3447_v30 = vld [vmem:[%s4987_s4 + $0x244] sm:$0xf0] }
 0x13a   : > { %1422 = vmatpush.bf16.msra.mxu0 %v2877_v39  ;;  %v2829_v28 = vor.u32 %v3448_v25, %v2826_v26  ;;  %v2817_v33 = vor.u32 %v3447_v30, %v2816_v29  ;;  %v3512_v25 = vld [vmem:[%s4989_s6 + $0x154] sm:$0xf]  ;;  %v2986_v26 = vld [vmem:[%s4989_s6 + $0x158] sm:$0xf0]  ;;  %v3056_v29 = vld [vmem:[%s4989_s6 + $0x1e0] sm:$0xf] }
 0x13b   : > { %v587_v38 = vadd.f32 %v3579_v9, %v581_v34  ;;  %v2821_v34 = vor.u32 %v3446_v31, %v2818_v32  ;;  %v3531_v30 = vld [vmem:[%s4989_s6 + $0x1e4] sm:$0xf0]  ;;  %v3530_v31 = vld [vmem:[%s4989_s6 + $0x1e4] sm:$0xf] }
 0x13c   : > { %v3057_v32 = vor.u32 %v3531_v30, %v3056_v29 }
 0x13d   : > { %v608_v41 = vrot.slane %v587_v38, 7  ;;  %v2810_v38 = vld [vmem:[%s4987_s4 + $0x238] sm:$0xf0] }
 0x13e   : > { %v662_v43 = vld [vmem:[#allocation2] sm:$0xfe]  ;;  %1423 = vmatpush.bf16.msra.mxu0 %v2869_v49  ;;  %v2805_v49 = vor.u32 %v3442_v46, %v2802_v47  ;;  %1757 = vmatpush.bf16.msra.mxu2 %v3057_v32  ;;  %v3050_v47 = vld [vmem:[%s4989_s6 + $0x1d8] sm:$0xf0]  ;;  %v3128_v32 = vld [vmem:[%s4989_s6 + $0x70] sm:$0xf] }
 0x13f   : > { %v4196_v45 = vsel %vm605_vm9, %v606_v23, %v608_v41  ;;  %622 = vst [vmem:[#allocation2 + $0x20] sm:$0x1] %v608_v41  ;;  %v2824_v23 = vld [vmem:[%s4987_s4 + $0x250] sm:$0xf]  ;;  %v624_v39 = vld [vmem:[#allocation2] sm:$0xff]  ;;  %v2813_v41 = vor.u32 %v3444_v37, %v2810_v38  ;;  %v2977_v38 = vor.u32 %v3511_v36, %v2976_v35 }
 0x140   : > { %v666_v48 = vpack.c.bf16 %v4196_v45, %v662_v43  ;;  %v2825_v27 = vor.u32 %v3449_v24, %v2824_v23  ;;  %v628_v43 = vpack.c.bf16 %v4196_v45, %v624_v39  ;;  %v3510_v37 = vld [vmem:[%s4989_s6 + $0x144] sm:$0xf]  ;;  %v2978_v39 = vld [vmem:[%s4989_s6 + $0x148] sm:$0xf0]  ;;  %v3484_v36 = vld [vmem:[%s4989_s6 + $0x74] sm:$0xf] }
 0x142   : > { %v707_v52 = vshll.u32 %v666_v48, 16  ;;  %1424 = vmatpush.bf16.msra.mxu0 %v2861_v59  ;;  %v705_v9 = vshrl.u32 %v666_v48, 16  ;;  %v2801_v48 = vor.u32 %v3443_v44, %v2800_v42  ;;  %v1162_v59 = vld [vmem:[#allocation2] sm:$0xfc]  ;;  %v3529_v42 = vld [vmem:[%s4989_s6 + $0x1d4] sm:$0xf0] }
 0x143   : > { %v4408_v44 = vpop.f32.mrf.mxu0 }
 0x144   : > { %v709_v2 = vrot.slane %v707_v52, 1  ;;  %v3440_v52 = vld [vmem:[%s4987_s4 + $0x214] sm:$0xf] }
 0x145   : > { %v2797_v56 = vor.u32 %v3440_v52, %v2794_v53  ;;  %v3508_v52 = vld [vmem:[%s4989_s6 + $0x134] sm:$0xf]  ;;  %v2970_v53 = vld [vmem:[%s4989_s6 + $0x138] sm:$0xf0] }
 0x146   : > { %v664_v62 = vld [vmem:[#allocation2 + $0x20] sm:$0x1]  ;;  %1425 = vmatpush.bf16.msra.mxu0 %v2853_v8  ;;  %v710_v11 = vor.u32 %v709_v2, %v705_v9 }
 0x147   : > { %v668_v1 = vpack.c.bf16 %v664_v62, %v664_v62  ;;  %v1164_v54 = vld [vmem:[#allocation2 + $0x20] sm:$0x3]  ;;  %v2786_v62 = vld [vmem:[%s4987_s4 + $0x208] sm:$0xf0] }
 0x148   : > { %v1168_v12 = vpack.c.bf16 %v1164_v54, %v1164_v54  ;;  %v2789_v0 = vor.u32 %v3438_v61, %v2786_v62  ;;  %v2992_v9 = vld [vmem:[%s4989_s6 + $0x160] sm:$0xf]  ;;  %v2973_v54 = vor.u32 %v3508_v52, %v2970_v53  ;;  %v3042_v62 = vld [vmem:[%s4989_s6 + $0x1c8] sm:$0xf0] }
 0x149   : > { %v712_v10 = vshll.u32 %v668_v1, 16  ;;  %1426 = vmatmul.bf16.vlgmr.msra.gmra.mxu0 %v1213_v7  ;;  %v1166_v1 = vpack.c.bf16 %v4196_v45, %v1162_v59  ;;  %v3516_v45 = vld [vmem:[%s4989_s6 + $0x174] sm:$0xf]  ;;  %v3002_v7 = vld [vmem:[%s4989_s6 + $0x178] sm:$0xf0] }
 0x14a   : > { %v1209_v2 = vrot.slane %v1168_v12, 1  ;;  %v3005_v8 = vor.u32 %v3516_v45, %v3002_v7  ;;  %v3045_v12 = vor.u32 %v3526_v58, %v3042_v62  ;;  %v3033_v45 = vor.u32 %v3525_v5, %v3032_v4  ;;  %v3034_v7 = vld [vmem:[%s4989_s6 + $0x1b8] sm:$0xf0]  ;;  %v3122_v52 = vld [vmem:[%s4989_s6 + $0x68] sm:$0xf0] }
 0x14b   : > { %v714_v14 = vrot.slane %v712_v10, 1  ;;  %v1208_v3 = vrot.slane %v1166_v1, 1  ;;  %v3515_v10 = vld [vmem:[%s4989_s6 + $0x164] sm:$0xf0]  ;;  %v3506_v1 = vld [vmem:[%s4989_s6 + $0x124] sm:$0xf] }
 0x14c   : > { %v3008_v53 = vld [vmem:[%s4989_s6 + $0x180] sm:$0xf]  ;;  %v3518_v62 = vld [vmem:[%s4989_s6 + $0x184] sm:$0xf]  ;;  %v3112_v5 = vld [vmem:[%s4989_s6 + $0x50] sm:$0xf] }
 0x14d   : > { %v715_v20 = vsel %vm703_vm10, %v710_v11, %v714_v14  ;;  %v1210_v57 = vsel %vm1207_vm11, %v1208_v3, %v1209_v2  ;;  %v3514_v11 = vld [vmem:[%s4989_s6 + $0x164] sm:$0xf]  ;;  %v2993_v14 = vor.u32 %v3515_v10, %v2992_v9  ;;  %v2962_v3 = vld [vmem:[%s4989_s6 + $0x128] sm:$0xf0]  ;;  %v2952_v9 = vld [vmem:[%s4989_s6 + $0x110] sm:$0xf] }
 0x14e   : > { %898 = vmatmul.bf16.vlgmr.msrb.gmra.mxu1 %v715_v20  ;;  %926 = vmatmul.bf16.vlgmr.msra.gmra.mxu3 %v715_v20  ;;  %v3066_v20 = vld [vmem:[%s4989_s6 + $0x1f8] sm:$0xf0]  ;;  %v3505_v10 = vld [vmem:[%s4989_s6 + $0x114] sm:$0xf0] }
 0x14f   : > { %1376 = vmatpush.bf16.msrb.mxu1 %v2841_v15  ;;  %1404 = vmatpush.bf16.msra.mxu3 %v2845_v16  ;;  %v2994_v15 = vld [vmem:[%s4989_s6 + $0x168] sm:$0xf0]  ;;  %v3069_v23 = vor.u32 %v3532_v18, %v3066_v20  ;;  %v3024_v18 = vld [vmem:[%s4989_s6 + $0x1a0] sm:$0xf]  ;;  %v3522_v20 = vld [vmem:[%s4989_s6 + $0x1a4] sm:$0xf] }
 0x150   : > { %v2997_v16 = vor.u32 %v3514_v11, %v2994_v15  ;;  %v3504_v11 = vld [vmem:[%s4989_s6 + $0x114] sm:$0xf]  ;;  %v4476_v15 = vpop.f32.mrf.mxu0 }
 0x151   : > { %1784 = vmatpush.bf16.msrb.mxu0 %v3069_v23  ;;  %v2957_v17 = vor.u32 %v3504_v11, %v2954_v63  ;;  %v3026_v23 = vld [vmem:[%s4989_s6 + $0x1a8] sm:$0xf0]  ;;  %v3184_v11 = vld [vmem:[%s4989_s6 + $0xe0] sm:$0xf]  ;;  %v3498_v63 = vld [vmem:[%s4989_s6 + $0xe4] sm:$0xf] }
 0x153   : > { %1377 = vmatpush.bf16.msrb.mxu1 %v2833_v21  ;;  %1405 = vmatpush.bf16.msra.mxu3 %v2837_v22  ;;  %v2984_v21 = vld [vmem:[%s4989_s6 + $0x150] sm:$0xf]  ;;  %v3513_v22 = vld [vmem:[%s4989_s6 + $0x154] sm:$0xf0] }
 0x154   : > { %v2985_v24 = vor.u32 %v3513_v22, %v2984_v21  ;;  %v3025_v22 = vor.u32 %v3523_v19, %v3024_v18  ;;  %v3186_v18 = vld [vmem:[%s4989_s6 + $0xe8] sm:$0xf0] }
 0x157   : > { %1378 = vmatpush.bf16.msrb.mxu1 %v2825_v27  ;;  %1406 = vmatpush.bf16.msra.mxu3 %v2829_v28  ;;  %v4373_v27 = vpop.f32.mrf.mxu2  ;;  %v2989_v28 = vor.u32 %v3512_v25, %v2986_v26  ;;  %v2944_v25 = vld [vmem:[%s4989_s6 + $0x100] sm:$0xf]  ;;  %v3503_v26 = vld [vmem:[%s4989_s6 + $0x104] sm:$0xf0] }
 0x158   : > { %v2945_v30 = vor.u32 %v3503_v26, %v2944_v25  ;;  %v3106_v26 = vld [vmem:[%s4989_s6 + $0x48] sm:$0xf0] }
 0x15b   : > { %1379 = vmatpush.bf16.msrb.mxu1 %v2817_v33  ;;  %1407 = vmatpush.bf16.msra.mxu3 %v2821_v34  ;;  %v3058_v33 = vld [vmem:[%s4989_s6 + $0x1e8] sm:$0xf0] }
 0x15c   : > { %v3061_v34 = vor.u32 %v3530_v31, %v3058_v33  ;;  %v2946_v31 = vld [vmem:[%s4989_s6 + $0x108] sm:$0xf0]  ;;  %v3485_v33 = vld [vmem:[%s4989_s6 + $0x74] sm:$0xf0] }
 0x15d   : > { %v3129_v35 = vor.u32 %v3485_v33, %v3128_v32  ;;  %v3497_v32 = vld [vmem:[%s4989_s6 + $0xd4] sm:$0xf0]  ;;  %v3496_v33 = vld [vmem:[%s4989_s6 + $0xd4] sm:$0xf] }
 0x15e   : > { %1114 = vmatmul.bf16.vlgmr.msra.gmra.mxu1 %v628_v43  ;;  %1142 = vmatmul.bf16.vlgmr.msrb.gmra.mxu3 %v628_v43  ;;  %v3528_v43 = vld [vmem:[%s4989_s6 + $0x1d4] sm:$0xf] }
 0x15f   : > { %1380 = vmatpush.bf16.msrb.mxu1 %v2809_v40  ;;  %1408 = vmatpush.bf16.msra.mxu3 %v2813_v41  ;;  %v2981_v40 = vor.u32 %v3510_v37, %v2978_v39  ;;  %v3048_v41 = vld [vmem:[%s4989_s6 + $0x1d0] sm:$0xf]  ;;  %v3053_v50 = vor.u32 %v3528_v43, %v3050_v47  ;;  %v4436_v60 = vpop.f32.mrf.mxu2  ;;  %v3130_v37 = vld [vmem:[%s4989_s6 + $0x78] sm:$0xf0] }
 0x160   : > { %1785 = vmatpush.bf16.msrb.mxu0 %v3061_v34  ;;  %v3049_v46 = vor.u32 %v3529_v42, %v3048_v41  ;;  %v3016_v39 = vld [vmem:[%s4989_s6 + $0x190] sm:$0xf]  ;;  %v3520_v41 = vld [vmem:[%s4989_s6 + $0x194] sm:$0xf]  ;;  %v3018_v43 = vld [vmem:[%s4989_s6 + $0x198] sm:$0xf0] }
 0x161   : > { %v3021_v47 = vor.u32 %v3520_v41, %v3018_v43  ;;  %v3476_v41 = vld [vmem:[%s4989_s6 + $0x34] sm:$0xf]  ;;  %v3168_v43 = vld [vmem:[%s4989_s6 + $0xc0] sm:$0xf] }
 0x162   : > { %1758 = vmatpush.bf16.msra.mxu2 %v3049_v46 }
 0x163   : > { %1381 = vmatpush.bf16.msrb.mxu1 %v2801_v48  ;;  %1409 = vmatpush.bf16.msra.mxu3 %v2805_v49  ;;  %v2968_v48 = vld [vmem:[%s4989_s6 + $0x130] sm:$0xf]  ;;  %v3509_v49 = vld [vmem:[%s4989_s6 + $0x134] sm:$0xf0] }
 0x164   : > { %v2969_v51 = vor.u32 %v3509_v49, %v2968_v48  ;;  %1786 = vmatpush.bf16.msrb.mxu0 %v3053_v50  ;;  %v3120_v48 = vld [vmem:[%s4989_s6 + $0x60] sm:$0xf]  ;;  %v3483_v49 = vld [vmem:[%s4989_s6 + $0x64] sm:$0xf0]  ;;  %v3482_v50 = vld [vmem:[%s4989_s6 + $0x64] sm:$0xf] }
 0x165   : > { %v3125_v58 = vor.u32 %v3482_v50, %v3122_v52  ;;  %v3170_v52 = vld [vmem:[%s4989_s6 + $0xc8] sm:$0xf0] }
 0x167   : > { %1382 = vmatpush.bf16.msrb.mxu1 %v2793_v55  ;;  %1410 = vmatpush.bf16.msra.mxu3 %v2797_v56  ;;  %v3040_v55 = vld [vmem:[%s4989_s6 + $0x1c0] sm:$0xf]  ;;  %v3527_v56 = vld [vmem:[%s4989_s6 + $0x1c4] sm:$0xf0]  ;;  %v4504_v29 = vpop.f32.mrf.mxu2 }
 0x168   : > { %v3041_v61 = vor.u32 %v3527_v56, %v3040_v55  ;;  %1787 = vmatpush.bf16.msrb.mxu0 %v3045_v12  ;;  %v4553_v55 = vpop.f32.mrf.mxu0  ;;  %v3010_v12 = vld [vmem:[%s4989_s6 + $0x188] sm:$0xf0] }
 0x16a   : > { %1759 = vmatpush.bf16.msra.mxu2 %v3041_v61 }
 0x16b   : > { %1383 = vmatpush.bf16.msrb.mxu1 %v2785_v13  ;;  %1411 = vmatpush.bf16.msra.mxu3 %v2789_v0  ;;  %v2960_v13 = vld [vmem:[%s4989_s6 + $0x120] sm:$0xf]  ;;  %v3507_v0 = vld [vmem:[%s4989_s6 + $0x124] sm:$0xf0] }
 0x16c   : > { %v2961_v2 = vor.u32 %v3507_v0, %v2960_v13  ;;  %v3192_v13 = vld [vmem:[%s4989_s6 + $0xf0] sm:$0xf]  ;;  %v3013_v0 = vor.u32 %v3518_v62, %v3010_v12 }
 0x16e   : > { %1384 = vmatmul.bf16.vlgmr.msrb.gmra.mxu1 %v1210_v57  ;;  %1412 = vmatmul.bf16.vlgmr.msra.gmra.mxu3 %v1210_v57  ;;  %v2965_v57 = vor.u32 %v3506_v1, %v2962_v3  ;;  %v3501_v1 = vld [vmem:[%s4989_s6 + $0xf4] sm:$0xf0]  ;;  %v3194_v3 = vld [vmem:[%s4989_s6 + $0xf8] sm:$0xf0] }
 0x16f   : > { %1742 = vmatpush.bf16.msra.mxu1 %v3001_v6  ;;  %1770 = vmatpush.bf16.msrb.mxu3 %v3005_v8  ;;  %v3524_v6 = vld [vmem:[%s4989_s6 + $0x1b4] sm:$0xf] }
 0x170   : > { %v3037_v8 = vor.u32 %v3524_v6, %v3034_v7  ;;  %1760 = vmatpush.bf16.msra.mxu2 %v3033_v45  ;;  %v3481_v45 = vld [vmem:[%s4989_s6 + $0x54] sm:$0xf0]  ;;  %v3480_v6 = vld [vmem:[%s4989_s6 + $0x54] sm:$0xf] }
 0x171   : > { %v3113_v7 = vor.u32 %v3481_v45, %v3112_v5  ;;  %v3473_v5 = vld [vmem:[%s4989_s6 + $0x14] sm:$0xf0] }
 0x172   : > { %1788 = vmatpush.bf16.msrb.mxu0 %v3037_v8  ;;  %v3114_v8 = vld [vmem:[%s4989_s6 + $0x58] sm:$0xf0] }
 0x173   : > { %1743 = vmatpush.bf16.msra.mxu1 %v2993_v14  ;;  %1771 = vmatpush.bf16.msrb.mxu3 %v2997_v16  ;;  %v2953_v16 = vor.u32 %v3505_v10, %v2952_v9  ;;  %v4585_v9 = vpop.f32.mrf.mxu2  ;;  %v3117_v10 = vor.u32 %v3480_v6, %v3114_v8 }
 0x174   : > { %1761 = vmatpush.bf16.msra.mxu2 %v3025_v22  ;;  %v3104_v22 = vld [vmem:[%s4989_s6 + $0x40] sm:$0xf] }
 0x177   : > { %1744 = vmatpush.bf16.msra.mxu1 %v2985_v24  ;;  %1772 = vmatpush.bf16.msrb.mxu3 %v2989_v28  ;;  %v3029_v24 = vor.u32 %v3522_v20, %v3026_v23  ;;  %v3502_v28 = vld [vmem:[%s4989_s6 + $0x104] sm:$0xf]  ;;  %v3189_v20 = vor.u32 %v3498_v63, %v3186_v18  ;;  %v3479_v23 = vld [vmem:[%s4989_s6 + $0x44] sm:$0xf0] }
 0x178   : > { %v2949_v34 = vor.u32 %v3502_v28, %v2946_v31  ;;  %v3105_v25 = vor.u32 %v3479_v23, %v3104_v22  ;;  %v3176_v31 = vld [vmem:[%s4989_s6 + $0xd0] sm:$0xf]  ;;  %v3490_v18 = vld [vmem:[%s4989_s6 + $0xa4] sm:$0xf]  ;;  %v3154_v23 = vld [vmem:[%s4989_s6 + $0xa8] sm:$0xf0] }
 0x179   : > { %1789 = vmatpush.bf16.msrb.mxu0 %v3029_v24  ;;  %v3478_v24 = vld [vmem:[%s4989_s6 + $0x44] sm:$0xf] }
 0x17b   : > { %1745 = vmatpush.bf16.msra.mxu1 %v2977_v38  ;;  %1773 = vmatpush.bf16.msrb.mxu3 %v2981_v40  ;;  %v3133_v38 = vor.u32 %v3484_v36, %v3130_v37  ;;  %v3521_v40 = vld [vmem:[%s4989_s6 + $0x194] sm:$0xf0]  ;;  %v4629_v37 = vpop.f32.mrf.mxu0 }
 0x17c   : > { %v3017_v42 = vor.u32 %v3521_v40, %v3016_v39  ;;  %v3096_v39 = vld [vmem:[%s4989_s6 + $0x30] sm:$0xf]  ;;  %v3477_v40 = vld [vmem:[%s4989_s6 + $0x34] sm:$0xf0] }
 0x17d   : > { %1790 = vmatpush.bf16.msrb.mxu0 %v3021_v47  ;;  %v3495_v47 = vld [vmem:[%s4989_s6 + $0xc4] sm:$0xf0] }
 0x17e   : > { %1762 = vmatpush.bf16.msra.mxu2 %v3017_v42  ;;  %v3098_v42 = vld [vmem:[%s4989_s6 + $0x38] sm:$0xf0]  ;;  %v3169_v50 = vor.u32 %v3495_v47, %v3168_v43 }
 0x17f   : > { %1746 = vmatpush.bf16.msra.mxu1 %v2969_v51  ;;  %1774 = vmatpush.bf16.msrb.mxu3 %v2973_v54  ;;  %v3121_v51 = vor.u32 %v3483_v49, %v3120_v48  ;;  %v3519_v54 = vld [vmem:[%s4989_s6 + $0x184] sm:$0xf0]  ;;  %v3101_v49 = vor.u32 %v3476_v41, %v3098_v42  ;;  %v3146_v41 = vld [vmem:[%s4989_s6 + $0x98] sm:$0xf0] }
 0x180   : > { %v3009_v61 = vor.u32 %v3519_v54, %v3008_v53  ;;  %v3088_v53 = vld [vmem:[%s4989_s6 + $0x20] sm:$0xf] }
 0x181   : > { %1791 = vmatpush.bf16.msrb.mxu0 %v3013_v0 }
 0x182   : > { %1763 = vmatpush.bf16.msra.mxu2 %v3009_v61  ;;  %v3090_v61 = vld [vmem:[%s4989_s6 + $0x28] sm:$0xf0] }
 0x183   : > { %1747 = vmatpush.bf16.msra.mxu1 %v2961_v2  ;;  %1775 = vmatpush.bf16.msrb.mxu3 %v2965_v57  ;;  %v3500_v2 = vld [vmem:[%s4989_s6 + $0xf4] sm:$0xf]  ;;  %v3193_v57 = vor.u32 %v3501_v1, %v3192_v13  ;;  %v3160_v1 = vld [vmem:[%s4989_s6 + $0xb0] sm:$0xf] }
 0x184   : > { %v3197_v4 = vor.u32 %v3500_v2, %v3194_v3  ;;  %v3493_v2 = vld [vmem:[%s4989_s6 + $0xb4] sm:$0xf0]  ;;  %v3492_v3 = vld [vmem:[%s4989_s6 + $0xb4] sm:$0xf] }
 0x186   : > { %1972 = vmatpush.bf16.msrb.mxu2 %v3193_v57  ;;  %2000 = vmatpush.bf16.msra.mxu0 %v3197_v4  ;;  %v3162_v57 = vld [vmem:[%s4989_s6 + $0xb8] sm:$0xf0]  ;;  %v3080_v4 = vld [vmem:[%s4989_s6 + $0x10] sm:$0xf] }
 0x187   : > { %1748 = vmatpush.bf16.msra.mxu1 %v2953_v16  ;;  %1776 = vmatpush.bf16.msrb.mxu3 %v2957_v17  ;;  %v3499_v16 = vld [vmem:[%s4989_s6 + $0xe4] sm:$0xf0] }
 0x188   : > { %v3185_v17 = vor.u32 %v3499_v16, %v3184_v11  ;;  %v3472_v11 = vld [vmem:[%s4989_s6 + $0x14] sm:$0xf]  ;;  %v3082_v16 = vld [vmem:[%s4989_s6 + $0x18] sm:$0xf0] }
 0x189   : > { %v3085_v22 = vor.u32 %v3472_v11, %v3082_v16 }
 0x18a   : > { %1973 = vmatpush.bf16.msrb.mxu2 %v3185_v17  ;;  %2001 = vmatpush.bf16.msra.mxu0 %v3189_v20  ;;  %v3165_v17 = vor.u32 %v3492_v3, %v3162_v57 }
 0x18b   : > { %1749 = vmatpush.bf16.msra.mxu1 %v2945_v30  ;;  %1777 = vmatpush.bf16.msrb.mxu3 %v2949_v34  ;;  %v3109_v30 = vor.u32 %v3478_v24, %v3106_v26  ;;  %v3177_v34 = vor.u32 %v3497_v32, %v3176_v31  ;;  %v3072_v24 = vld [vmem:[%s4989_s6] sm:$0xf] }
 0x18e   : > { %1974 = vmatpush.bf16.msrb.mxu2 %v3177_v34 }
 0x18f   : > { %1958 = vmatpush.bf16.msrb.mxu1 %v3129_v35  ;;  %1986 = vmatpush.bf16.msra.mxu3 %v3133_v38  ;;  %v3178_v35 = vld [vmem:[%s4989_s6 + $0xd8] sm:$0xf0] }
 0x190   : > { %v3181_v38 = vor.u32 %v3496_v33, %v3178_v35 }
 0x192   : > { %2002 = vmatpush.bf16.msra.mxu0 %v3181_v38  ;;  %1975 = vmatpush.bf16.msrb.mxu2 %v3169_v50  ;;  %v3489_v38 = vld [vmem:[%s4989_s6 + $0x94] sm:$0xf0] }
 0x193   : > { %1959 = vmatpush.bf16.msrb.mxu1 %v3121_v51  ;;  %1987 = vmatpush.bf16.msra.mxu3 %v3125_v58  ;;  %v3494_v51 = vld [vmem:[%s4989_s6 + $0xc4] sm:$0xf] }
 0x194   : > { %v3173_v54 = vor.u32 %v3494_v51, %v3170_v52  ;;  %v3474_v58 = vld [vmem:[%s4989_s6 + $0x24] sm:$0xf] }
 0x195   : > { %v3093_v0 = vor.u32 %v3474_v58, %v3090_v61 }
 0x196   : > { %2003 = vmatpush.bf16.msra.mxu0 %v3173_v54 }
 0x197   : > { %1960 = vmatpush.bf16.msrb.mxu1 %v3113_v7  ;;  %1988 = vmatpush.bf16.msra.mxu3 %v3117_v10  ;;  %v3161_v10 = vor.u32 %v3493_v2, %v3160_v1 }
 0x199   : > { %1976 = vmatpush.bf16.msrb.mxu2 %v3161_v10 }
 0x19a   : > { %2004 = vmatpush.bf16.msra.mxu0 %v3165_v17 }
 0x19b   : > { %1961 = vmatpush.bf16.msrb.mxu1 %v3105_v25  ;;  %1989 = vmatpush.bf16.msra.mxu3 %v3109_v30  ;;  %v3471_v25 = vld [vmem:[%s4989_s6 + $0x4] sm:$0xf0] }
 0x19c   : > { %v3073_v35 = vor.u32 %v3471_v25, %v3072_v24  ;;  %v3549_v24 = vld [vmem:[%s4989_s6 + $0x274] sm:$0xf0]  ;;  %v3548_v25 = vld [vmem:[%s4989_s6 + $0x274] sm:$0xf] }
 0x19f   : > { %1990 = vmatpush.bf16.msra.mxu3 %v3101_v49 }
 0x1a3   : > { %1991 = vmatpush.bf16.msra.mxu3 %v3093_v0 }
 0x1a7   : > { %1992 = vmatpush.bf16.msra.mxu3 %v3085_v22 }
 0x1b7   : > { %v1399_v12 = vpop.f32.mrf.mxu2 }
 0x1bf   : > { %v1401_v50 = vpop.f32.mrf.mxu2 }
 0x1c6   : > { %v1427_v32 = vpop.f32.mrf.mxu0 }
 0x1cb   : > { %v4434_v59 = vpop.f32.mrf.mxu1 }
 0x1cc   : > { %v914_v36 = vadd.f32 %v4373_v27, %v4434_v59  ;;  %v4643_v27 = vld [vmem:[%s4988_s5] sm:$0x3]  ;;  %v3097_v59 = vor.u32 %v3477_v40, %v3096_v39  ;;  %v3488_v40 = vld [vmem:[%s4989_s6 + $0x94] sm:$0xf] }
 0x1cd   : > { %v1438_v8 = vperm.slane %v4643_v27, 0  ;;  %v1439_v47 = vperm.slane %v4643_v27, 1  ;;  %v3149_v58 = vor.u32 %v3488_v40, %v3146_v41 }
 0x1ce   : > { %1962 = vmatpush.bf16.msrb.mxu1 %v3097_v59  ;;  %v1429_v57 = vpop.f32.mrf.mxu0 }
 0x1d1   : > { %v4474_v14 = vpop.f32.mrf.mxu3 }
 0x1d2   : > { %v942_v45 = vadd.f32 %v4408_v44, %v4474_v14  ;;  %v3081_v44 = vor.u32 %v3473_v5, %v3080_v4  ;;  %v3152_v14 = vld [vmem:[%s4989_s6 + $0xa0] sm:$0xf] }
 0x1d3   : > { %v4490_v21 = vpop.f32.mrf.mxu1 }
 0x1d4   : > { %v916_v20 = vadd.f32 %v4436_v60, %v4490_v21  ;;  %v3470_v60 = vld [vmem:[%s4989_s6 + $0x4] sm:$0xf]  ;;  %v3074_v21 = vld [vmem:[%s4989_s6 + $0x8] sm:$0xf0] }
 0x1d9   : > { %v4533_v46 = vpop.f32.mrf.mxu3 }
 0x1db   : > { %v1115_v56 = vpop.f32.mrf.mxu1 }
 0x1dc   : > { %v1116_v48 = vadd.f32 %v1115_v56, %v914_v36  ;;  %v3475_v56 = vld [vmem:[%s4989_s6 + $0x24] sm:$0xf0]  ;;  %v3144_v36 = vld [vmem:[%s4989_s6 + $0x90] sm:$0xf] }
 0x1dd   : > { %v3089_v13 = vor.u32 %v3475_v56, %v3088_v53  ;;  %v3145_v52 = vor.u32 %v3489_v38, %v3144_v36  ;;  %v3546_v36 = vld [vmem:[%s4989_s6 + $0x264] sm:$0xf]  ;;  %v3282_v38 = vld [vmem:[%s4989_s6 + $0x268] sm:$0xf0] }
 0x1de   : > { %v1130_v6 = vadd.f32 %v4504_v29, %v1116_v48  ;;  %v3491_v29 = vld [vmem:[%s4989_s6 + $0xa4] sm:$0xf0]  ;;  %v944_v48 = vadd.f32 %v4476_v15, %v4533_v46  ;;  %v3486_v46 = vld [vmem:[%s4989_s6 + $0x84] sm:$0xf] }
 0x1df   : > { %1963 = vmatpush.bf16.msrb.mxu1 %v3089_v13  ;;  %v3153_v33 = vor.u32 %v3491_v29, %v3152_v14  ;;  %v3487_v15 = vld [vmem:[%s4989_s6 + $0x84] sm:$0xf0] }
 0x1e1   : > { %v4599_v19 = vpop.f32.mrf.mxu3  ;;  %1977 = vmatpush.bf16.msrb.mxu2 %v3153_v33 }
 0x1e2   : > { %v1144_v26 = vadd.f32 %v4599_v19, %v942_v45  ;;  %v3157_v19 = vor.u32 %v3490_v18, %v3154_v23  ;;  %v3288_v23 = vld [vmem:[%s4989_s6 + $0x270] sm:$0xf] }
 0x1e3   : > { %v4613_v28 = vpop.f32.mrf.mxu1  ;;  %1964 = vmatpush.bf16.msrb.mxu1 %v3081_v44  ;;  %v3289_v33 = vor.u32 %v3549_v24, %v3288_v23  ;;  %v3559_v23 = vld [vmem:[%s4989_s6 + $0x2c4] sm:$0xf0]  ;;  %v3558_v24 = vld [vmem:[%s4989_s6 + $0x2c4] sm:$0xf] }
 0x1e4   : > { %v1118_v31 = vadd.f32 %v4613_v28, %v916_v20  ;;  %v3077_v28 = vor.u32 %v3470_v60, %v3074_v21  ;;  %v1158_v59 = vadd.f32 %v4553_v55, %v1144_v26  ;;  %2005 = vmatpush.bf16.msra.mxu0 %v3157_v19  ;;  %v3136_v55 = vld [vmem:[%s4989_s6 + $0x80] sm:$0xf]  ;;  %v3290_v26 = vld [vmem:[%s4989_s6 + $0x278] sm:$0xf0] }
 0x1e5   : > { %1978 = vmatpush.bf16.msrb.mxu2 %v3145_v52  ;;  %v3137_v0 = vor.u32 %v3487_v15, %v3136_v55  ;;  %v3280_v19 = vld [vmem:[%s4989_s6 + $0x260] sm:$0xf]  ;;  %v3272_v52 = vld [vmem:[%s4989_s6 + $0x250] sm:$0xf] }
 0x1e6   : > { %v1132_v49 = vadd.f32 %v4585_v9, %v1118_v31  ;;  %1993 = vmatpush.bf16.msra.mxu3 %v3077_v28  ;;  %v3138_v9 = vld [vmem:[%s4989_s6 + $0x88] sm:$0xf0] }
 0x1e7   : > { %1965 = vmatpush.bf16.msrb.mxu1 %v3073_v35  ;;  %v3141_v3 = vor.u32 %v3486_v46, %v3138_v9  ;;  %v3547_v35 = vld [vmem:[%s4989_s6 + $0x264] sm:$0xf0]  ;;  %v3344_v9 = vld [vmem:[%s4989_s6 + $0x2e0] sm:$0xf] }
 0x1e8   : > { %2006 = vmatpush.bf16.msra.mxu0 %v3149_v58 }
 0x1e9   : > { %v4672_v62 = vpop.f32.mrf.mxu3  ;;  %1979 = vmatpush.bf16.msrb.mxu2 %v3137_v0 }
 0x1ea   : > { %v1146_v61 = vadd.f32 %v4672_v62, %v944_v48  ;;  %v3281_v48 = vor.u32 %v3547_v35, %v3280_v19  ;;  %v3320_v35 = vld [vmem:[%s4989_s6 + $0x2b0] sm:$0xf] }
 0x1eb   : > { %v1385_v7 = vpop.f32.mrf.mxu1 }
 0x1ec   : > { %v1400_v63 = vadd.f32 %v1399_v12, %v1385_v7  ;;  %v1160_v5 = vadd.f32 %v4629_v37, %v1146_v61  ;;  %2007 = vmatpush.bf16.msra.mxu0 %v3141_v3  ;;  %v3563_v61 = vld [vmem:[%s4989_s6 + $0x2e4] sm:$0xf0]  ;;  %v3264_v3 = vld [vmem:[%s4989_s6 + $0x240] sm:$0xf] }
 0x1ee   : > { %v1432_v30 = vadd.f32 %v1400_v63, %v1130_v6 }
 0x1f0   : > { %v1442_v34 = vadd.f32 %v1438_v8, %v1432_v30 }
 0x1f1   : > { %v1413_v39 = vpop.f32.mrf.mxu3 }
 0x1f2   : > { %v1446_v42 = vmax.f32 %v1442_v34, 0.0  ;;  %v1428_v43 = vadd.f32 %v1427_v32, %v1413_v39  ;;  %v3293_v34 = vor.u32 %v3548_v25, %v3290_v26  ;;  %v3330_v25 = vld [vmem:[%s4989_s6 + $0x2c8] sm:$0xf0] }
 0x1f3   : > { %v1387_v51 = vpop.f32.mrf.mxu1  ;;  %v3333_v19 = vor.u32 %v3558_v24, %v3330_v25 }
 0x1f4   : > { %v1459_v53 = vrot.slane %v1446_v42, 7  ;;  %v1433_v54 = vadd.f32 %v1428_v43, %v1158_v59  ;;  %v1402_v56 = vadd.f32 %v1401_v50, %v1387_v51  ;;  %v3352_v59 = vld [vmem:[%s4989_s6 + $0x2f0] sm:$0xf]  ;;  %v3565_v42 = vld [vmem:[%s4989_s6 + $0x2f4] sm:$0xf0] }
 0x1f5   : > { %v3564_v43 = vld [vmem:[%s4989_s6 + $0x2f4] sm:$0xf]  ;;  %v3353_v15 = vor.u32 %v3565_v42, %v3352_v59  ;;  %v3240_v59 = vld [vmem:[%s4989_s6 + $0x210] sm:$0xf]  ;;  %v3537_v42 = vld [vmem:[%s4989_s6 + $0x214] sm:$0xf0] }
 0x1f6   : > { %1471 = vst [vmem:[#allocation3] sm:$0xfe] %v1459_v53  ;;  %v1443_v12 = vadd.f32 %v1439_v47, %v1433_v54  ;;  %v1434_v13 = vadd.f32 %v1402_v56, %v1132_v49  ;;  %v3285_v49 = vor.u32 %v3546_v36, %v3282_v38  ;;  %v3544_v54 = vld [vmem:[%s4989_s6 + $0x254] sm:$0xf]  ;;  %v3274_v56 = vld [vmem:[%s4989_s6 + $0x258] sm:$0xf0] }
 0x1f7   : > { %v3557_v36 = vld [vmem:[%s4989_s6 + $0x2b4] sm:$0xf0]  ;;  %v3556_v38 = vld [vmem:[%s4989_s6 + $0x2b4] sm:$0xf] }
 0x1f8   : > { %v1447_v1 = vmax.f32 %v1443_v12, 0.0  ;;  %v1444_v2 = vadd.f32 %v1438_v8, %v1434_v13  ;;  %v3562_v12 = vld [vmem:[%s4989_s6 + $0x2e4] sm:$0xf]  ;;  %v3346_v13 = vld [vmem:[%s4989_s6 + $0x2e8] sm:$0xf0] }
 0x1f9   : > { %v1415_v4 = vpop.f32.mrf.mxu3 }
 0x1fa   : > { %v1460_v45 = vrot.slane %v1447_v1, 7  ;;  %v1448_v6 = vmax.f32 %v1444_v2, 0.0  ;;  %v1430_v7 = vadd.f32 %v1429_v57, %v1415_v4  ;;  %v3277_v2 = vor.u32 %v3544_v54, %v3274_v56  ;;  %v3543_v57 = vld [vmem:[%s4989_s6 + $0x244] sm:$0xf0]  ;;  %v3542_v4 = vld [vmem:[%s4989_s6 + $0x244] sm:$0xf] }
 0x1fb   : > { %v3314_v54 = vld [vmem:[%s4989_s6 + $0x2a8] sm:$0xf0] }
 0x1fc   : > { %1472 = vst [vmem:[#allocation3 + $0x8] sm:$0xfe] %v1460_v45  ;;  %v1461_v62 = vrot.slane %v1448_v6, 7  ;;  %v1435_v10 = vadd.f32 %v1430_v7, %v1160_v5  ;;  %v3266_v5 = vld [vmem:[%s4989_s6 + $0x248] sm:$0xf0]  ;;  %v3349_v6 = vor.u32 %v3562_v12, %v3346_v13 }
 0x1fd   : > { %v1515_v11 = vld [vmem:[#allocation3] sm:$0xfe] }
 0x1fe   : > { %v4766_v16 = vsel %vm605_vm9, %v1459_v53, %v1461_v62  ;;  %1475 = vst [vmem:[#allocation3 + $0x20] sm:$0x1] %v1461_v62  ;;  %v1445_v27 = vadd.f32 %v1439_v47, %v1435_v10  ;;  %v3354_v47 = vld [vmem:[%s4989_s6 + $0x2f8] sm:$0xf0]  ;;  %v3545_v53 = vld [vmem:[%s4989_s6 + $0x254] sm:$0xf0] }
 0x1ff   : > { %v1519_v8 = vpack.c.bf16 %v4766_v16, %v1515_v11  ;;  %v3357_v46 = vor.u32 %v3564_v43, %v3354_v47  ;;  %v3273_v1 = vor.u32 %v3545_v53, %v3272_v52  ;;  %v3336_v7 = vld [vmem:[%s4989_s6 + $0x2d0] sm:$0xf]  ;;  %v3561_v62 = vld [vmem:[%s4989_s6 + $0x2d4] sm:$0xf0]  ;;  %v3560_v10 = vld [vmem:[%s4989_s6 + $0x2d4] sm:$0xf] }
 0x200   : > { %v1449_v63 = vmax.f32 %v1445_v27, 0.0  ;;  %v3338_v11 = vld [vmem:[%s4989_s6 + $0x2d8] sm:$0xf0]  ;;  %v3265_v27 = vor.u32 %v3543_v57, %v3264_v3  ;;  %v3536_v43 = vld [vmem:[%s4989_s6 + $0x214] sm:$0xf] }
 0x201   : > { %v1559_v44 = vshll.u32 %v1519_v8, 16  ;;  %v1557_v30 = vshrl.u32 %v1519_v8, 16  ;;  %v3269_v8 = vor.u32 %v3542_v4, %v3266_v5  ;;  %v3242_v47 = vld [vmem:[%s4989_s6 + $0x218] sm:$0xf0]  ;;  %v3554_v53 = vld [vmem:[%s4989_s6 + $0x2a4] sm:$0xf] }
 0x202   : > { %v1463_v17 = vrot.slane %v1449_v63, 7  ;;  %v3256_v63 = vld [vmem:[%s4989_s6 + $0x230] sm:$0xf]  ;;  %v3553_v3 = vld [vmem:[%s4989_s6 + $0x294] sm:$0xf0] }
 0x203   : > { %v1516_v37 = vld [vmem:[#allocation3 + $0x8] sm:$0xfe]  ;;  %v1561_v22 = vrot.slane %v1559_v44, 1  ;;  %v3540_v44 = vld [vmem:[%s4989_s6 + $0x234] sm:$0xf] }
 0x204   : > { %v4770_v14 = vsel %vm605_vm9, %v1460_v45, %v1463_v17  ;;  %1476 = vst [vmem:[#allocation3 + $0x28] sm:$0x1] %v1463_v17  ;;  %v3345_v45 = vor.u32 %v3563_v61, %v3344_v9  ;;  %v3541_v17 = vld [vmem:[%s4989_s6 + $0x234] sm:$0xf0]  ;;  %v3534_v9 = vld [vmem:[%s4989_s6 + $0x204] sm:$0xf] }
 0x205   : > { %v1517_v29 = vld [vmem:[#allocation3 + $0x20] sm:$0x1]  ;;  %v1520_v18 = vpack.c.bf16 %v4770_v14, %v1516_v37  ;;  %v1562_v31 = vor.u32 %v1561_v22, %v1557_v30  ;;  %v3258_v37 = vld [vmem:[%s4989_s6 + $0x238] sm:$0xf0]  ;;  %v3328_v22 = vld [vmem:[%s4989_s6 + $0x2c0] sm:$0xf]  ;;  %v3257_v26 = vor.u32 %v3541_v17, %v3256_v63 }
 0x206   : > { %v1521_v20 = vpack.c.bf16 %v1517_v29, %v1517_v29  ;;  %v3337_v29 = vor.u32 %v3561_v62, %v3336_v7  ;;  %v3261_v30 = vor.u32 %v3540_v44, %v3258_v37  ;;  %v2016_v56 = vld [vmem:[#allocation3 + $0x20] sm:$0x3]  ;;  %v3234_v61 = vld [vmem:[%s4989_s6 + $0x208] sm:$0xf0]  ;;  %v2014_v12 = vld [vmem:[#allocation3] sm:$0xfc] }
 0x207   : > { %v1571_v21 = vshll.u32 %v1520_v18, 16  ;;  %v1569_v50 = vshrl.u32 %v1520_v18, 16  ;;  %v3341_v18 = vor.u32 %v3560_v10, %v3338_v11  ;;  %v3552_v57 = vld [vmem:[%s4989_s6 + $0x294] sm:$0xf]  ;;  %v3306_v4 = vld [vmem:[%s4989_s6 + $0x298] sm:$0xf0] }
 0x208   : > { %v1564_v60 = vshll.u32 %v1521_v20, 16  ;;  %v1477_v20 = vld [vmem:[#allocation3] sm:$0xff]  ;;  %v3309_v10 = vor.u32 %v3552_v57, %v3306_v4  ;;  %v3550_v63 = vld [vmem:[%s4989_s6 + $0x284] sm:$0xf]  ;;  %v2015_v17 = vld [vmem:[#allocation3 + $0x8] sm:$0xfc] }
 0x209   : > { %v1573_v41 = vrot.slane %v1571_v21, 1  ;;  %v1481_v21 = vpack.c.bf16 %v4766_v16, %v1477_v20 }
 0x20a   : > { %v1566_v32 = vrot.slane %v1564_v60, 1  ;;  %v3248_v60 = vld [vmem:[%s4989_s6 + $0x220] sm:$0xf] }
 0x20b   : > { %v1518_v39 = vld [vmem:[#allocation3 + $0x28] sm:$0x1]  ;;  %v1574_v58 = vor.u32 %v1573_v41, %v1569_v50  ;;  %v3312_v50 = vld [vmem:[%s4989_s6 + $0x2a0] sm:$0xf] }
 0x20c   : > { %v1567_v28 = vsel %vm703_vm10, %v1562_v31, %v1566_v32  ;;  %v1522_v40 = vpack.c.bf16 %v1518_v39, %v1518_v39  ;;  %v3539_v31 = vld [vmem:[%s4989_s6 + $0x224] sm:$0xf0]  ;;  %v3538_v32 = vld [vmem:[%s4989_s6 + $0x224] sm:$0xf]  ;;  %v3322_v39 = vld [vmem:[%s4989_s6 + $0x2b8] sm:$0xf0] }
 0x20d   : > { %1750 = vmatmul.bf16.vlgmr.msra.gmra.mxu1 %v1567_v28  ;;  %1778 = vmatmul.bf16.vlgmr.msrb.gmra.mxu3 %v1567_v28  ;;  %v3249_v28 = vor.u32 %v3539_v31, %v3248_v60  ;;  %v1478_v41 = vld [vmem:[#allocation3 + $0x8] sm:$0xff] }
 0x20e   : > { %2227 = vmatpush.bf16.msra.mxu1 %v3289_v33  ;;  %2255 = vmatpush.bf16.msrb.mxu3 %v3293_v34  ;;  %v1576_v51 = vshll.u32 %v1522_v40, 16  ;;  %v3250_v33 = vld [vmem:[%s4989_s6 + $0x228] sm:$0xf0]  ;;  %v3329_v34 = vor.u32 %v3559_v23, %v3328_v22  ;;  %v1482_v52 = vpack.c.bf16 %v4770_v14, %v1478_v41  ;;  %v2017_v7 = vld [vmem:[#allocation3 + $0x28] sm:$0x3]  ;;  %v2019_v22 = vpack.c.bf16 %v4770_v14, %v2015_v17 }
 0x20f   : > { %v3253_v40 = vor.u32 %v3538_v32, %v3250_v33  ;;  %v2021_v37 = vpack.c.bf16 %v2017_v7, %v2017_v7 }
 0x210   : > { %v1578_v55 = vrot.slane %v1576_v51, 1  ;;  %v3555_v51 = vld [vmem:[%s4989_s6 + $0x2a4] sm:$0xf0]  ;;  %v2062_v24 = vrot.slane %v2019_v22, 1 }
 0x211   : > { %v3313_v13 = vor.u32 %v3555_v51, %v3312_v50  ;;  %v2063_v23 = vrot.slane %v2021_v37, 1 }
 0x212   : > { %2228 = vmatpush.bf16.msra.mxu1 %v3281_v48  ;;  %2256 = vmatpush.bf16.msrb.mxu3 %v3285_v49  ;;  %v1579_v0 = vsel %vm703_vm10, %v1574_v58, %v1578_v55  ;;  %v3321_v48 = vor.u32 %v3557_v36, %v3320_v35  ;;  %v3325_v49 = vor.u32 %v3556_v38, %v3322_v39 }
 0x213   : > { %1764 = vmatmul.bf16.vlgmr.msra.gmra.mxu2 %v1579_v0  ;;  %1792 = vmatmul.bf16.vlgmr.msrb.gmra.mxu0 %v1579_v0  ;;  %v3241_v58 = vor.u32 %v3537_v42, %v3240_v59  ;;  %v3245_v55 = vor.u32 %v3536_v43, %v3242_v47  ;;  %v3317_v0 = vor.u32 %v3554_v53, %v3314_v54  ;;  %v2287_v42 = vld [vmem:[%s4990_s7] sm:$0x3] }
 0x214   : > { %2241 = vmatpush.bf16.msra.mxu2 %v3353_v15  ;;  %2269 = vmatpush.bf16.msrb.mxu0 %v3357_v46  ;;  %v3232_v15 = vld [vmem:[%s4989_s6 + $0x200] sm:$0xf]  ;;  %v3535_v46 = vld [vmem:[%s4989_s6 + $0x204] sm:$0xf0]  ;;  %v2064_v25 = vsel %vm1207_vm11, %v2062_v24, %v2063_v23  ;;  %v2290_v50 = vperm.slane %v2287_v42, 1 }
 0x215   : > { %v3233_v5 = vor.u32 %v3535_v46, %v3232_v15 }
 0x216   : > { %2229 = vmatpush.bf16.msra.mxu1 %v3273_v1  ;;  %2257 = vmatpush.bf16.msrb.mxu3 %v3277_v2  ;;  %v3304_v1 = vld [vmem:[%s4989_s6 + $0x290] sm:$0xf]  ;;  %v2020_v2 = vpack.c.bf16 %v2016_v56, %v2016_v56 }
 0x217   : > { %v3305_v62 = vor.u32 %v3553_v3, %v3304_v1 }
 0x218   : > { %2242 = vmatpush.bf16.msra.mxu2 %v3345_v45  ;;  %2270 = vmatpush.bf16.msrb.mxu0 %v3349_v6  ;;  %v3237_v45 = vor.u32 %v3534_v9, %v3234_v61  ;;  %v2018_v6 = vpack.c.bf16 %v4766_v16, %v2014_v12  ;;  %v2060_v11 = vrot.slane %v2020_v2, 1  ;;  %v3298_v16 = vld [vmem:[%s4989_s6 + $0x288] sm:$0xf0]  ;;  %v2289_v12 = vperm.slane %v2287_v42, 0 }
 0x219   : > { %v3301_v20 = vor.u32 %v3550_v63, %v3298_v16 }
 0x21a   : > { %2230 = vmatpush.bf16.msra.mxu1 %v3265_v27  ;;  %2258 = vmatpush.bf16.msrb.mxu3 %v3269_v8  ;;  %v3296_v27 = vld [vmem:[%s4989_s6 + $0x280] sm:$0xf]  ;;  %v3551_v8 = vld [vmem:[%s4989_s6 + $0x284] sm:$0xf0]  ;;  %v2059_v44 = vrot.slane %v2018_v6, 1 }
 0x21c   : > { %2243 = vmatpush.bf16.msra.mxu2 %v3337_v29  ;;  %2271 = vmatpush.bf16.msrb.mxu0 %v3341_v18  ;;  %v3297_v29 = vor.u32 %v3551_v8, %v3296_v27  ;;  %v2061_v18 = vsel %vm1207_vm11, %v2059_v44, %v2060_v11 }
 0x21d   : > { %1966 = vmatmul.bf16.vlgmr.msrb.gmra.mxu1 %v1481_v21  ;;  %1994 = vmatmul.bf16.vlgmr.msra.gmra.mxu3 %v1481_v21 }
 0x21e   : > { %2231 = vmatpush.bf16.msra.mxu1 %v3257_v26  ;;  %2259 = vmatpush.bf16.msrb.mxu3 %v3261_v30 }
 0x220   : > { %2244 = vmatpush.bf16.msra.mxu2 %v3329_v34  ;;  %2272 = vmatpush.bf16.msrb.mxu0 %v3333_v19 }
 0x222   : > { %2232 = vmatpush.bf16.msra.mxu1 %v3249_v28  ;;  %2260 = vmatpush.bf16.msrb.mxu3 %v3253_v40 }
 0x223   : > { %1980 = vmatmul.bf16.vlgmr.msrb.gmra.mxu2 %v1482_v52  ;;  %2008 = vmatmul.bf16.vlgmr.msra.gmra.mxu0 %v1482_v52 }
 0x224   : > { %2245 = vmatpush.bf16.msra.mxu2 %v3321_v48  ;;  %2273 = vmatpush.bf16.msrb.mxu0 %v3325_v49 }
 0x226   : > { %2233 = vmatpush.bf16.msra.mxu1 %v3241_v58  ;;  %2261 = vmatpush.bf16.msrb.mxu3 %v3245_v55 }
 0x228   : > { %2246 = vmatpush.bf16.msra.mxu2 %v3313_v13  ;;  %2274 = vmatpush.bf16.msrb.mxu0 %v3317_v0 }
 0x22a   : > { %2234 = vmatpush.bf16.msra.mxu1 %v3233_v5  ;;  %2262 = vmatpush.bf16.msrb.mxu3 %v3237_v45 }
 0x22c   : > { %2247 = vmatpush.bf16.msra.mxu2 %v3305_v62  ;;  %2275 = vmatpush.bf16.msrb.mxu0 %v3309_v10 }
 0x22d   : > { %2235 = vmatmul.bf16.vlgmr.msra.gmra.mxu1 %v2061_v18  ;;  %2263 = vmatmul.bf16.vlgmr.msrb.gmra.mxu3 %v2061_v18 }
 0x230   : > { %2248 = vmatpush.bf16.msra.mxu2 %v3297_v29  ;;  %2276 = vmatpush.bf16.msrb.mxu0 %v3301_v20 }
 0x233   : > { %2249 = vmatmul.bf16.vlgmr.msra.gmra.mxu2 %v2064_v25  ;;  %2277 = vmatmul.bf16.vlgmr.msrb.gmra.mxu0 %v2064_v25 }
 0x28a   : > { %v1751_v26 = vpop.f32.mrf.mxu1 }
 0x290   : > { %v1779_v30 = vpop.f32.mrf.mxu3  ;;  %v1793_v60 = vpop.f32.mrf.mxu0 }
 0x291   : > { %v1794_v40 = vadd.f32 %v1793_v60, %v1779_v30 }
 0x292   : > { %v1753_v21 = vpop.f32.mrf.mxu1 }
 0x296   : > { %v1765_v31 = vpop.f32.mrf.mxu2 }
 0x297   : > { %v1766_v51 = vadd.f32 %v1765_v31, %v1751_v26 }
 0x298   : > { %v1781_v32 = vpop.f32.mrf.mxu3  ;;  %v1795_v33 = vpop.f32.mrf.mxu0 }
 0x299   : > { %v1796_v52 = vadd.f32 %v1795_v33, %v1781_v32 }
 0x29a   : > { %v1967_v19 = vpop.f32.mrf.mxu1 }
 0x29b   : > { %v1968_v56 = vadd.f32 %v1967_v19, %v1766_v51 }
 0x29e   : > { %v1767_v34 = vpop.f32.mrf.mxu2 }
 0x29f   : > { %v1768_v57 = vadd.f32 %v1767_v34, %v1753_v21 }
 0x2a0   : > { %v1995_v14 = vpop.f32.mrf.mxu3  ;;  %v2009_v35 = vpop.f32.mrf.mxu0 }
 0x2a1   : > { %v1996_v41 = vadd.f32 %v1995_v14, %v1794_v40 }
 0x2a2   : > { %v1969_v28 = vpop.f32.mrf.mxu1 }
 0x2a3   : > { %v2010_v48 = vadd.f32 %v2009_v35, %v1996_v41  ;;  %v1970_v45 = vadd.f32 %v1969_v28, %v1768_v57 }
 0x2a6   : > { %v1981_v36 = vpop.f32.mrf.mxu2 }
 0x2a7   : > { %v1982_v46 = vadd.f32 %v1981_v36, %v1968_v56 }
 0x2a8   : > { %v1997_v38 = vpop.f32.mrf.mxu3  ;;  %v2011_v39 = vpop.f32.mrf.mxu0 }
 0x2a9   : > { %v1998_v58 = vadd.f32 %v1997_v38, %v1796_v52 }
 0x2aa   : > { %v2236_v54 = vpop.f32.mrf.mxu1 }
 0x2ab   : > { %v2012_v1 = vadd.f32 %v2011_v39, %v1998_v58 }
 0x2ae   : > { %v1983_v59 = vpop.f32.mrf.mxu2 }
 0x2af   : > { %v1984_v11 = vadd.f32 %v1983_v59, %v1970_v45 }
 0x2b0   : > { %v2264_v43 = vpop.f32.mrf.mxu3  ;;  %v2278_v47 = vpop.f32.mrf.mxu0 }
 0x2b1   : > { %v2279_v49 = vadd.f32 %v2278_v47, %v2264_v43 }
 0x2b2   : > { %v2238_v62 = vpop.f32.mrf.mxu1 }
 0x2b3   : > { %v2284_v53 = vadd.f32 %v2279_v49, %v2010_v48 }
 0x2b5   : > { %v2294_v55 = vadd.f32 %v2290_v50, %v2284_v53 }
 0x2b6   : > { %v2250_v15 = vpop.f32.mrf.mxu2 }
 0x2b7   : > { %v2298_v9 = vmax.f32 %v2294_v55, 0.0  ;;  %v2251_v61 = vadd.f32 %v2250_v15, %v2236_v54 }
 0x2b8   : > { %v2266_v13 = vpop.f32.mrf.mxu3  ;;  %v2280_v0 = vpop.f32.mrf.mxu0 }
 0x2b9   : > { %2302 = vst [vmem:[%s322_s16 + $0x8] sm:$0xff] %v2298_v9  ;;  %v2283_v2 = vadd.f32 %v2251_v61, %v1982_v46  ;;  %v2281_v3 = vadd.f32 %v2280_v0, %v2266_v13 }
 0x2bb   : > { %v2293_v4 = vadd.f32 %v2289_v12, %v2283_v2  ;;  %v2286_v5 = vadd.f32 %v2281_v3, %v2012_v1 }
 0x2bd   : > { %v2297_v6 = vmax.f32 %v2293_v4, 0.0  ;;  %v2296_v7 = vadd.f32 %v2290_v50, %v2286_v5 }
 0x2be   : > { %v2252_v10 = vpop.f32.mrf.mxu2 }
 0x2bf   : > { %2301 = vst [vmem:[%s322_s16] sm:$0xff] %v2297_v6  ;;  %v2300_v27 = vmax.f32 %v2296_v7, 0.0  ;;  %v2253_v8 = vadd.f32 %v2252_v10, %v2238_v62 }
 0x2c1   : > { %2304 = vst [vmem:[%s322_s16 + $0x18] sm:$0xff] %v2300_v27  ;;  %v2285_v63 = vadd.f32 %v2253_v8, %v1984_v11 }
 0x2c3   : > { %v2295_v16 = vadd.f32 %v2289_v12, %v2285_v63 }
 0x2c5   : > { %v2299_v17 = vmax.f32 %v2295_v16, 0.0 }
 0x2c7   : > { %2303 = vst [vmem:[%s322_s16 + $0x10] sm:$0xff] %v2299_v17 }
 0x2c8 PF: > { %s18_s27 = sadd.s32 1, %s3586_s27  }
 0x2c9   : > { %p15_p4 = scmp.ge.s32.totalorder %s18_s27, 4  }
 0x2cb   :  { %17 = sbr.rel (!%p15_p4) target bundleno = 1 (0x1), region = 93 }

</bundles_post_ra>
